<compile_context>
chip_gen: v5e
topology: v5e:2x2
jax: 0.10.0
libtpu: 0.0.40
codegen_flags: <defaults>
</compile_context>

<pallas_src>
import functools

import jax
import jax.numpy as jnp
from jax.experimental import pallas as pl
from jax.experimental.pallas import tpu as pltpu

LANE = 128


def _round_up(x, m):
    return ((x + m - 1) // m) * m


# ---------------------------------------------------------------------------
# Fused Pallas kernel: full TAGCN forward (all layers, all hops) in one call
# ---------------------------------------------------------------------------
def _tagcn_fused_kernel(a_ref, h_ref, *wb_and_out, n_layers: int, k: int,
                        fp: int):
    """a_ref: [Np,Np] bf16, h_ref: [Np,Fp] f32,
    wb_and_out = (w0, b0, w1, b1, ..., o_ref); every w is [(k+1)*Fp, Fp] bf16,
    every b is [1, Fp] f32, o_ref is [Np, Fp] f32."""
    o_ref = wb_and_out[-1]
    wb_refs = wb_and_out[:-1]

    a = a_ref[...]                                   # bf16 adjacency, reused
    h = h_ref[...]                                   # f32 activations

    for l in range(n_layers):
        w_ref = wb_refs[2 * l]                       # bf16 [(k+1)*Fp, Fp]
        b_ref = wb_refs[2 * l + 1]                   # f32  [1, Fp]

        # Downcast only at the MXU boundary; elementwise stays f32 (v5e VPU).
        hb = h.astype(jnp.bfloat16)
        # Hop-0 projection against a static row-slice of W (free Ref view).
        out = jnp.dot(hb, w_ref[0:fp, :],
                      preferred_element_type=jnp.float32)
        hk = hb
        for hop in range(1, k + 1):
            # Hop propagation on the bf16 MXU path with f32 accumulation.
            hk = jnp.dot(a, hk,
                         preferred_element_type=jnp.float32).astype(
                             jnp.bfloat16)
            out += jnp.dot(hk, w_ref[hop * fp:(hop + 1) * fp, :],
                           preferred_element_type=jnp.float32)

        out = out + b_ref[...]
        if l != n_layers - 1:
            out = jnp.maximum(out, 0.0)              # ReLU on all but last
        h = out

    o_ref[...] = h


# ---------------------------------------------------------------------------
# One-time preprocessing: pad to lane-dense shapes, cast MXU operands to bf16
# ---------------------------------------------------------------------------
def prepare_inputs(a_hat, features, params):
    """Pads A / features / weights once (hoisted out of the jitted forward)."""
    n, f_in = features.shape
    n_layers = len(params)
    n_classes = params[-1][0].shape[1]
    k = params[0][0].shape[0] // f_in - 1            # hops from weight shape

    widths = [f_in] + [w.shape[1] for (w, _b) in params]
    fp = _round_up(max(widths), LANE)
    np_ = _round_up(max(n, LANE), LANE)

    a_p = jnp.pad(a_hat.astype(jnp.float32),
                  ((0, np_ - n), (0, np_ - n))).astype(jnp.bfloat16)
    h_p = jnp.pad(features.astype(jnp.float32),
                  ((0, np_ - n), (0, fp - f_in)))

    wb = []
    fin_l = f_in
    for (w, b) in params:
        fout_l = w.shape[1]
        assert w.shape[0] == (k + 1) * fin_l, \
            "inconsistent hop count (k) across TAGConv layers"
        wk = w.astype(jnp.float32).reshape(k + 1, fin_l, fout_l)
        wk = jnp.pad(wk, ((0, 0), (0, fp - fin_l), (0, fp - fout_l)))
        wb.append(wk.reshape((k + 1) * fp, fp).astype(jnp.bfloat16))
        wb.append(jnp.pad(b.astype(jnp.float32),
                          (0, fp - fout_l)).reshape(1, fp))
        fin_l = fout_l

    meta = dict(n=n, n_classes=n_classes, n_layers=n_layers, k=k)
    return a_p, h_p, tuple(wb), meta


# ---------------------------------------------------------------------------
# Jitted fused forward on the pre-padded operands
# ---------------------------------------------------------------------------
@functools.partial(jax.jit, static_argnames=("n_layers", "k"))
def tagcn_forward_padded(a_p, h_p, wb_flat, *, n_layers, k):
    np_, fp = h_p.shape
    kernel = functools.partial(_tagcn_fused_kernel,
                               n_layers=n_layers, k=k, fp=fp)

    # Advisory cost estimate: k hop matmuls + (k+1) projection dots per layer.
    flops = n_layers * (k * 2 * np_ * np_ * fp + (k + 1) * 2 * np_ * fp * fp)
    bytes_accessed = (a_p.size * 2 + h_p.size * 4 + np_ * fp * 4
                      + sum(int(x.size) * x.dtype.itemsize for x in wb_flat))

    in_specs = [
        pl.BlockSpec((np_, np_), lambda i: (0, 0)),     # A_hat (bf16)
        pl.BlockSpec((np_, fp), lambda i: (0, 0)),      # node features (f32)
    ]
    for _ in range(n_layers):
        in_specs.append(pl.BlockSpec(((k + 1) * fp, fp),
                                     lambda i: (0, 0)))  # W_l (bf16)
        in_specs.append(pl.BlockSpec((1, fp), lambda i: (0, 0)))  # b_l (f32)

    return pl.pallas_call(
        kernel,
        out_shape=jax.ShapeDtypeStruct((np_, fp), jnp.float32),
        grid=(1,),
        in_specs=in_specs,
        out_specs=pl.BlockSpec((np_, fp), lambda i: (0, 0)),
        compiler_params=pltpu.CompilerParams(
            dimension_semantics=("arbitrary",)),
        cost_estimate=pl.CostEstimate(
            flops=flops, transcendentals=0, bytes_accessed=bytes_accessed),
    )(a_p, h_p, *wb_flat)


def tagcn_forward(a_hat, features, params):
    """Convenience end-to-end forward (pads, runs kernel, slices padding)."""
    a_p, h_p, wb_flat, meta = prepare_inputs(a_hat, features, params)
    out_p = tagcn_forward_padded(a_p, h_p, wb_flat,
                                 n_layers=meta["n_layers"], k=meta["k"])
    return out_p[:meta["n"], :meta["n_classes"]]


# ---------------------------------------------------------------------------
# Pure-JAX reference (f32) for a correctness check
# ---------------------------------------------------------------------------
def tagcn_reference(a_hat, features, params):
    h = features
    for i, (w, b) in enumerate(params):
        fin = h.shape[1]
        k = w.shape[0] // fin - 1
        hops = [h]
        for _ in range(k):
            hops.append(a_hat @ hops[-1])
        hs = jnp.concatenate(hops, axis=1)
        h = hs @ w + b
        if i != len(params) - 1:
            h = jnp.maximum(h, 0.0)
    return h


# ---------------------------------------------------------------------------
# Param / graph construction (deterministic, synthetic)
# ---------------------------------------------------------------------------
def init_tagcn_params(key, in_feats, n_hidden, n_classes, n_layers, k=2):
    """Layer l: Linear((k+1)*f_in_l, f_out_l) with bias, matching DGL TAGConv."""
    dims = [(in_feats, n_hidden)]
    dims += [(n_hidden, n_hidden)] * (n_layers - 1)
    dims += [(n_hidden, n_classes)]
    params = []
    for (fin, fout) in dims:
        key, kw = jax.random.split(key)
        fan_in = (k + 1) * fin
        scale = 1.0 / jnp.sqrt(jnp.float32(fan_in))
        w = jax.random.normal(kw, ((k + 1) * fin, fout), jnp.float32) * scale
        b = jnp.zeros((fout,), jnp.float32)
        params.append((w, b))
    return params


def build_normalized_adjacency(key, n_nodes, edge_prob=0.15):
    """Dense symmetric random graph, normalized as D^{-1/2} A D^{-1/2}."""
    a = (jax.random.uniform(key, (n_nodes, n_nodes)) < edge_prob).astype(
        jnp.float32)
    a = jnp.maximum(a, a.T)                               # symmetric
    a = a * (1.0 - jnp.eye(n_nodes, dtype=jnp.float32))   # no self loops
    deg = jnp.clip(a.sum(axis=1), 1.0, None)
    d_inv_sqrt = 1.0 / jnp.sqrt(deg)
    return a * d_inv_sqrt[:, None] * d_inv_sqrt[None, :]


if __name__ == "__main__":
    # Small, TPU-friendly shapes.
    N_NODES = 64
    IN_FEATS = 16
    N_HIDDEN = 32
    N_CLASSES = 4
    N_LAYERS = 2   # -> 3 TAGConv layers total (hidden, hidden, classes)

    key = jax.random.PRNGKey(0)
    k_graph, k_feat, k_params = jax.random.split(key, 3)

    a_hat = build_normalized_adjacency(k_graph, N_NODES)
    features = jax.random.normal(k_feat, (N_NODES, IN_FEATS), jnp.float32)
    params = init_tagcn_params(k_params, IN_FEATS, N_HIDDEN, N_CLASSES,
                               N_LAYERS)

    # One-time padding / bf16 cast (reused across forward calls).
    a_p, h_p, wb_flat, meta = prepare_inputs(a_hat, features, params)

    out_p = tagcn_forward_padded(a_p, h_p, wb_flat,
                                 n_layers=meta["n_layers"], k=meta["k"])
    out_p = jax.block_until_ready(out_p)
    out = out_p[:meta["n"], :meta["n_classes"]]

    assert out.shape == (N_NODES, N_CLASSES)
    assert out.dtype == jnp.float32
    assert bool(jnp.all(jnp.isfinite(out)))

    # Loose correctness check vs. f32 reference (bf16 MXU path in-kernel).
    ref = tagcn_reference(a_hat, features, params)
    rel_err = float(jnp.max(jnp.abs(out - ref)) /
                    (jnp.max(jnp.abs(ref)) + 1e-6))
    assert rel_err < 5e-2, f"relative error too large: {rel_err}"

    print("KERNEL_OK")
</pallas_src>

<mosaic_0001>
module attributes {stable_mosaic.version = 11 : i64} {
  func.func @_tagcn_fused_kernel(%arg0: i32, %arg1: memref<128x128xbf16, #tpu.memory_space<vmem>>, %arg2: memref<128x128xf32, #tpu.memory_space<vmem>>, %arg3: memref<384x128xbf16, #tpu.memory_space<vmem>>, %arg4: memref<1x128xf32, #tpu.memory_space<vmem>>, %arg5: memref<384x128xbf16, #tpu.memory_space<vmem>>, %arg6: memref<1x128xf32, #tpu.memory_space<vmem>>, %arg7: memref<384x128xbf16, #tpu.memory_space<vmem>>, %arg8: memref<1x128xf32, #tpu.memory_space<vmem>>, %arg9: memref<128x128xf32, #tpu.memory_space<vmem>>) attributes {dimension_semantics = [#tpu.dimension_semantics<arbitrary>], iteration_bounds = array<i64: 1>, scalar_prefetch = 0 : i64, scratch_operands = 0 : i64, tpu.core_type = #tpu.core_type<tc>, window_params = [{pipeline_mode = #tpu.pipeline_mode<synchronous>, transform_indices = @transform_0, window_bounds = array<i64: 128, 128>}, {pipeline_mode = #tpu.pipeline_mode<synchronous>, transform_indices = @transform_1, window_bounds = array<i64: 128, 128>}, {pipeline_mode = #tpu.pipeline_mode<synchronous>, transform_indices = @transform_2, window_bounds = array<i64: 384, 128>}, {pipeline_mode = #tpu.pipeline_mode<synchronous>, transform_indices = @transform_3, window_bounds = array<i64: 1, 128>}, {pipeline_mode = #tpu.pipeline_mode<synchronous>, transform_indices = @transform_4, window_bounds = array<i64: 384, 128>}, {pipeline_mode = #tpu.pipeline_mode<synchronous>, transform_indices = @transform_5, window_bounds = array<i64: 1, 128>}, {pipeline_mode = #tpu.pipeline_mode<synchronous>, transform_indices = @transform_6, window_bounds = array<i64: 384, 128>}, {pipeline_mode = #tpu.pipeline_mode<synchronous>, transform_indices = @transform_7, window_bounds = array<i64: 1, 128>}, {pipeline_mode = #tpu.pipeline_mode<synchronous>, transform_indices = @transform_8, window_bounds = array<i64: 128, 128>}]} {
    %c0 = arith.constant 0 : index
    %c0_0 = arith.constant 0 : index
    %0 = vector.load %arg1[%c0, %c0_0] : memref<128x128xbf16, #tpu.memory_space<vmem>>, vector<128x128xbf16>
    %c0_1 = arith.constant 0 : index
    %c0_2 = arith.constant 0 : index
    %1 = vector.load %arg2[%c0_1, %c0_2] : memref<128x128xf32, #tpu.memory_space<vmem>>, vector<128x128xf32>
    %2 = arith.truncf %1 : vector<128x128xf32> to vector<128x128xbf16>
    %c0_3 = arith.constant 0 : index
    %c0_4 = arith.constant 0 : index
    %3 = vector.load %arg3[%c0_3, %c0_4] : memref<384x128xbf16, #tpu.memory_space<vmem>>, vector<128x128xbf16>
    %cst = arith.constant dense<0.000000e+00> : vector<128x128xf32>
    %4 = tpu.matmul %2, %3, %cst {dimension_numbers = #tpu.dot_dimension_numbers<[1], [0], [0], [1], [0, 0, 1, 1], [], []>} : vector<128x128xbf16>, vector<128x128xbf16>, vector<128x128xf32> -> vector<128x128xf32>
    %cst_5 = arith.constant dense<0.000000e+00> : vector<128x128xf32>
    %5 = tpu.matmul %0, %2, %cst_5 {dimension_numbers = #tpu.dot_dimension_numbers<[1], [0], [0], [1], [0, 0, 1, 1], [], []>} : vector<128x128xbf16>, vector<128x128xbf16>, vector<128x128xf32> -> vector<128x128xf32>
    %6 = arith.truncf %5 : vector<128x128xf32> to vector<128x128xbf16>
    %c128 = arith.constant 128 : index
    %c0_6 = arith.constant 0 : index
    %7 = vector.load %arg3[%c128, %c0_6] : memref<384x128xbf16, #tpu.memory_space<vmem>>, vector<128x128xbf16>
    %cst_7 = arith.constant dense<0.000000e+00> : vector<128x128xf32>
    %8 = tpu.matmul %6, %7, %cst_7 {dimension_numbers = #tpu.dot_dimension_numbers<[1], [0], [0], [1], [0, 0, 1, 1], [], []>} : vector<128x128xbf16>, vector<128x128xbf16>, vector<128x128xf32> -> vector<128x128xf32>
    %9 = arith.addf %4, %8 : vector<128x128xf32>
    %cst_8 = arith.constant dense<0.000000e+00> : vector<128x128xf32>
    %10 = tpu.matmul %0, %6, %cst_8 {dimension_numbers = #tpu.dot_dimension_numbers<[1], [0], [0], [1], [0, 0, 1, 1], [], []>} : vector<128x128xbf16>, vector<128x128xbf16>, vector<128x128xf32> -> vector<128x128xf32>
    %11 = arith.truncf %10 : vector<128x128xf32> to vector<128x128xbf16>
    %c256 = arith.constant 256 : index
    %c0_9 = arith.constant 0 : index
    %12 = vector.load %arg3[%c256, %c0_9] : memref<384x128xbf16, #tpu.memory_space<vmem>>, vector<128x128xbf16>
    %cst_10 = arith.constant dense<0.000000e+00> : vector<128x128xf32>
    %13 = tpu.matmul %11, %12, %cst_10 {dimension_numbers = #tpu.dot_dimension_numbers<[1], [0], [0], [1], [0, 0, 1, 1], [], []>} : vector<128x128xbf16>, vector<128x128xbf16>, vector<128x128xf32> -> vector<128x128xf32>
    %14 = arith.addf %9, %13 : vector<128x128xf32>
    %c0_11 = arith.constant 0 : index
    %c0_12 = arith.constant 0 : index
    %15 = vector.load %arg4[%c0_11, %c0_12] : memref<1x128xf32, #tpu.memory_space<vmem>>, vector<1x128xf32>
    %16 = vector.broadcast %15 : vector<1x128xf32> to vector<128x128xf32>
    %17 = arith.addf %14, %16 : vector<128x128xf32>
    %cst_13 = arith.constant 0.000000e+00 : f32
    %18 = vector.broadcast %cst_13 : f32 to vector<128x128xf32>
    %19 = arith.maximumf %17, %18 : vector<128x128xf32>
    %20 = arith.truncf %19 : vector<128x128xf32> to vector<128x128xbf16>
    %c0_14 = arith.constant 0 : index
    %c0_15 = arith.constant 0 : index
    %21 = vector.load %arg5[%c0_14, %c0_15] : memref<384x128xbf16, #tpu.memory_space<vmem>>, vector<128x128xbf16>
    %cst_16 = arith.constant dense<0.000000e+00> : vector<128x128xf32>
    %22 = tpu.matmul %20, %21, %cst_16 {dimension_numbers = #tpu.dot_dimension_numbers<[1], [0], [0], [1], [0, 0, 1, 1], [], []>} : vector<128x128xbf16>, vector<128x128xbf16>, vector<128x128xf32> -> vector<128x128xf32>
    %cst_17 = arith.constant dense<0.000000e+00> : vector<128x128xf32>
    %23 = tpu.matmul %0, %20, %cst_17 {dimension_numbers = #tpu.dot_dimension_numbers<[1], [0], [0], [1], [0, 0, 1, 1], [], []>} : vector<128x128xbf16>, vector<128x128xbf16>, vector<128x128xf32> -> vector<128x128xf32>
    %24 = arith.truncf %23 : vector<128x128xf32> to vector<128x128xbf16>
    %c128_18 = arith.constant 128 : index
    %c0_19 = arith.constant 0 : index
    %25 = vector.load %arg5[%c128_18, %c0_19] : memref<384x128xbf16, #tpu.memory_space<vmem>>, vector<128x128xbf16>
    %cst_20 = arith.constant dense<0.000000e+00> : vector<128x128xf32>
    %26 = tpu.matmul %24, %25, %cst_20 {dimension_numbers = #tpu.dot_dimension_numbers<[1], [0], [0], [1], [0, 0, 1, 1], [], []>} : vector<128x128xbf16>, vector<128x128xbf16>, vector<128x128xf32> -> vector<128x128xf32>
    %27 = arith.addf %22, %26 : vector<128x128xf32>
    %cst_21 = arith.constant dense<0.000000e+00> : vector<128x128xf32>
    %28 = tpu.matmul %0, %24, %cst_21 {dimension_numbers = #tpu.dot_dimension_numbers<[1], [0], [0], [1], [0, 0, 1, 1], [], []>} : vector<128x128xbf16>, vector<128x128xbf16>, vector<128x128xf32> -> vector<128x128xf32>
    %29 = arith.truncf %28 : vector<128x128xf32> to vector<128x128xbf16>
    %c256_22 = arith.constant 256 : index
    %c0_23 = arith.constant 0 : index
    %30 = vector.load %arg5[%c256_22, %c0_23] : memref<384x128xbf16, #tpu.memory_space<vmem>>, vector<128x128xbf16>
    %cst_24 = arith.constant dense<0.000000e+00> : vector<128x128xf32>
    %31 = tpu.matmul %29, %30, %cst_24 {dimension_numbers = #tpu.dot_dimension_numbers<[1], [0], [0], [1], [0, 0, 1, 1], [], []>} : vector<128x128xbf16>, vector<128x128xbf16>, vector<128x128xf32> -> vector<128x128xf32>
    %32 = arith.addf %27, %31 : vector<128x128xf32>
    %c0_25 = arith.constant 0 : index
    %c0_26 = arith.constant 0 : index
    %33 = vector.load %arg6[%c0_25, %c0_26] : memref<1x128xf32, #tpu.memory_space<vmem>>, vector<1x128xf32>
    %34 = vector.broadcast %33 : vector<1x128xf32> to vector<128x128xf32>
    %35 = arith.addf %32, %34 : vector<128x128xf32>
    %cst_27 = arith.constant 0.000000e+00 : f32
    %36 = vector.broadcast %cst_27 : f32 to vector<128x128xf32>
    %37 = arith.maximumf %35, %36 : vector<128x128xf32>
    %38 = arith.truncf %37 : vector<128x128xf32> to vector<128x128xbf16>
    %c0_28 = arith.constant 0 : index
    %c0_29 = arith.constant 0 : index
    %39 = vector.load %arg7[%c0_28, %c0_29] : memref<384x128xbf16, #tpu.memory_space<vmem>>, vector<128x128xbf16>
    %cst_30 = arith.constant dense<0.000000e+00> : vector<128x128xf32>
    %40 = tpu.matmul %38, %39, %cst_30 {dimension_numbers = #tpu.dot_dimension_numbers<[1], [0], [0], [1], [0, 0, 1, 1], [], []>} : vector<128x128xbf16>, vector<128x128xbf16>, vector<128x128xf32> -> vector<128x128xf32>
    %cst_31 = arith.constant dense<0.000000e+00> : vector<128x128xf32>
    %41 = tpu.matmul %0, %38, %cst_31 {dimension_numbers = #tpu.dot_dimension_numbers<[1], [0], [0], [1], [0, 0, 1, 1], [], []>} : vector<128x128xbf16>, vector<128x128xbf16>, vector<128x128xf32> -> vector<128x128xf32>
    %42 = arith.truncf %41 : vector<128x128xf32> to vector<128x128xbf16>
    %c128_32 = arith.constant 128 : index
    %c0_33 = arith.constant 0 : index
    %43 = vector.load %arg7[%c128_32, %c0_33] : memref<384x128xbf16, #tpu.memory_space<vmem>>, vector<128x128xbf16>
    %cst_34 = arith.constant dense<0.000000e+00> : vector<128x128xf32>
    %44 = tpu.matmul %42, %43, %cst_34 {dimension_numbers = #tpu.dot_dimension_numbers<[1], [0], [0], [1], [0, 0, 1, 1], [], []>} : vector<128x128xbf16>, vector<128x128xbf16>, vector<128x128xf32> -> vector<128x128xf32>
    %45 = arith.addf %40, %44 : vector<128x128xf32>
    %cst_35 = arith.constant dense<0.000000e+00> : vector<128x128xf32>
    %46 = tpu.matmul %0, %42, %cst_35 {dimension_numbers = #tpu.dot_dimension_numbers<[1], [0], [0], [1], [0, 0, 1, 1], [], []>} : vector<128x128xbf16>, vector<128x128xbf16>, vector<128x128xf32> -> vector<128x128xf32>
    %47 = arith.truncf %46 : vector<128x128xf32> to vector<128x128xbf16>
    %c256_36 = arith.constant 256 : index
    %c0_37 = arith.constant 0 : index
    %48 = vector.load %arg7[%c256_36, %c0_37] : memref<384x128xbf16, #tpu.memory_space<vmem>>, vector<128x128xbf16>
    %cst_38 = arith.constant dense<0.000000e+00> : vector<128x128xf32>
    %49 = tpu.matmul %47, %48, %cst_38 {dimension_numbers = #tpu.dot_dimension_numbers<[1], [0], [0], [1], [0, 0, 1, 1], [], []>} : vector<128x128xbf16>, vector<128x128xbf16>, vector<128x128xf32> -> vector<128x128xf32>
    %50 = arith.addf %45, %49 : vector<128x128xf32>
    %c0_39 = arith.constant 0 : index
    %c0_40 = arith.constant 0 : index
    %51 = vector.load %arg8[%c0_39, %c0_40] : memref<1x128xf32, #tpu.memory_space<vmem>>, vector<1x128xf32>
    %52 = vector.broadcast %51 : vector<1x128xf32> to vector<128x128xf32>
    %53 = arith.addf %50, %52 : vector<128x128xf32>
    %c0_41 = arith.constant 0 : index
    %c0_42 = arith.constant 0 : index
    %54 = vector.load %arg9[%c0_41, %c0_42] : memref<128x128xf32, #tpu.memory_space<vmem>>, vector<128x128xf32>
    tpu.vector_store %arg9[%c0_41, %c0_42], %53 {strides = array<i32>} : memref<128x128xf32, #tpu.memory_space<vmem>>, vector<128x128xf32>,
    return
  }
  func.func @transform_0(%arg0: i32) -> (i32, i32) {
    %c0_i32 = arith.constant 0 : i32
    %c0_i32_0 = arith.constant 0 : i32
    %c0_i32_1 = arith.constant 0 : i32
    return %c0_i32, %c0_i32_0 : i32, i32
  }
  func.func @transform_1(%arg0: i32) -> (i32, i32) {
    %c0_i32 = arith.constant 0 : i32
    %c0_i32_0 = arith.constant 0 : i32
    %c0_i32_1 = arith.constant 0 : i32
    return %c0_i32, %c0_i32_0 : i32, i32
  }
  func.func @transform_2(%arg0: i32) -> (i32, i32) {
    %c0_i32 = arith.constant 0 : i32
    %c0_i32_0 = arith.constant 0 : i32
    %c0_i32_1 = arith.constant 0 : i32
    return %c0_i32, %c0_i32_0 : i32, i32
  }
  func.func @transform_3(%arg0: i32) -> (i32, i32) {
    %c0_i32 = arith.constant 0 : i32
    %c0_i32_0 = arith.constant 0 : i32
    %c0_i32_1 = arith.constant 0 : i32
    return %c0_i32, %c0_i32_0 : i32, i32
  }
  func.func @transform_4(%arg0: i32) -> (i32, i32) {
    %c0_i32 = arith.constant 0 : i32
    %c0_i32_0 = arith.constant 0 : i32
    %c0_i32_1 = arith.constant 0 : i32
    return %c0_i32, %c0_i32_0 : i32, i32
  }
  func.func @transform_5(%arg0: i32) -> (i32, i32) {
    %c0_i32 = arith.constant 0 : i32
    %c0_i32_0 = arith.constant 0 : i32
    %c0_i32_1 = arith.constant 0 : i32
    return %c0_i32, %c0_i32_0 : i32, i32
  }
  func.func @transform_6(%arg0: i32) -> (i32, i32) {
    %c0_i32 = arith.constant 0 : i32
    %c0_i32_0 = arith.constant 0 : i32
    %c0_i32_1 = arith.constant 0 : i32
    return %c0_i32, %c0_i32_0 : i32, i32
  }
  func.func @transform_7(%arg0: i32) -> (i32, i32) {
    %c0_i32 = arith.constant 0 : i32
    %c0_i32_0 = arith.constant 0 : i32
    %c0_i32_1 = arith.constant 0 : i32
    return %c0_i32, %c0_i32_0 : i32, i32
  }
  func.func @transform_8(%arg0: i32) -> (i32, i32) {
    %c0_i32 = arith.constant 0 : i32
    %c0_i32_0 = arith.constant 0 : i32
    %c0_i32_1 = arith.constant 0 : i32
    return %c0_i32, %c0_i32_0 : i32, i32
  }
}

</mosaic_0001>

<bundles_post_ra>
// kernel: tagcn_forward_padded.1
= control target key start
LH: loop header
LB: loop body
LE: loop exit
PB: predicated region body
PF: predicated region fallthrough
CT: control target
= control target key end

     0   :  { %13 = vsyncpa [#allocation3], 0  ;;  %s2639_s0 = inlined_call_operand.hbm [shape: bf16[128,128], index: 0, kind: input, shape index: {}]   ;;  %s2640_s1 = inlined_call_operand.hbm [shape: f32[128,128], index: 1, kind: input, shape index: {}]   ;;  %s2641_s2 = inlined_call_operand.hbm [shape: bf16[384,128], index: 2, kind: input, shape index: {}]   ;;  %s2642_s3 = inlined_call_operand.vmem [shape: f32[1,128], index: 3, kind: input, shape index: {}]   ;;  %s2643_s4 = inlined_call_operand.hbm [shape: bf16[384,128], index: 4, kind: input, shape index: {}]   ;;  %s2644_s5 = inlined_call_operand.vmem [shape: f32[1,128], index: 5, kind: input, shape index: {}]   ;;  %s2645_s6 = inlined_call_operand.hbm [shape: bf16[384,128], index: 6, kind: input, shape index: {}]   ;;  %s2646_s7 = inlined_call_operand.vmem [shape: f32[1,128], index: 7, kind: input, shape index: {}]   ;;  %s2647_s8 = inlined_call_operand.hbm [shape: f32[128,128], index: 8, kind: output, shape index: {}]  }
   0x1   :  { %14 = vsyncpa [#allocation6], 0 }
   0x2   :  { %15 = vsyncpa [#allocation9], 0  ;;  %s34_s29 = sshll.u32 %s2640_s1, 4  ;;  %s35_s29 = int_to_ptr.hbm [resolvable:$true] %s34_s29 }
   0x3   :  { %16 = vsyncpa [#allocation4], 0  ;;  %s2345_s30 = smov [#allocation5]   ;;  %s2346_s10 = smov 128  }
   0x4   :  { %s36_s9 = sshll.u32 %s2345_s30, 4  ;;  %s2347_s11 = smov 8   ;;  %s37_s9 = int_to_ptr.vmem [resolvable:$true] %s36_s9 }
   0x5   :  { %42 = dma.hbm_to_vmem [thread:$0]  %s35_s29, 2048, %s37_s9, [#allocation6], %s2346_s10, %s2346_s10, %s2347_s11  }
   0x6   :  { %s62_s14 = sshll.u32 %s2643_s4, 4  ;;  %s2348_s15 = smov [#allocation8]   ;;  %s63_s14 = int_to_ptr.hbm [resolvable:$true] %s62_s14 }
   0x7   :  { %s64_s16 = sshll.u32 %s2348_s15, 4  ;;  %s21_s18 = sshll.u32 %s2639_s0, 4  ;;  %s65_s16 = int_to_ptr.vmem [resolvable:$true] %s64_s16  ;;  %s22_s18 = int_to_ptr.hbm [resolvable:$true] %s21_s18 }
   0x8   :  { %s2349_s19 = smov 64   ;;  %s2350_s20 = smov 4  }
   0x9   :  { %70 = dma.hbm_to_vmem [thread:$0]  %s63_s14, 3072, %s65_s16, [#allocation9], %s2349_s19, %s2349_s19, %s2350_s20  }
   0xa   :  { %s47_s23 = sshll.u32 %s2641_s2, 4  ;;  %s2351_s24 = smov [#allocation2]   ;;  %s48_s23 = int_to_ptr.hbm [resolvable:$true] %s47_s23 }
   0xb   :  { %s23_s25 = sshll.u32 %s2351_s24, 4  ;;  %s2352_s4 = smov [#allocation7]   ;;  %s24_s25 = int_to_ptr.vmem [resolvable:$true] %s23_s25 }
   0xc   :  { %29 = dma.hbm_to_vmem [thread:$0]  %s22_s18, 1024, %s24_s25, [#allocation3], %s2349_s19, %s2349_s19, %s2350_s20  }
   0xd   :  { %s49_s26 = sshll.u32 %s2352_s4, 4  ;;  %s77_s0 = sshll.u32 %s2645_s6, 4  ;;  %s50_s26 = int_to_ptr.vmem [resolvable:$true] %s49_s26  ;;  %s78_s0 = int_to_ptr.hbm [resolvable:$true] %s77_s0 }
   0xe   :  { %55 = dma.hbm_to_vmem [thread:$0]  %s48_s23, 3072, %s50_s26, [#allocation6], %s2349_s19, %s2349_s19, %s2350_s20  }
   0xf   :  { %s2353_s29 = smov [#allocation10]  }
  0x10   :  { %s79_s30 = sshll.u32 %s2353_s29, 4  ;;  %s80_s30 = int_to_ptr.vmem [resolvable:$true] %s79_s30 }
  0x11   :  { %85 = dma.hbm_to_vmem [thread:$0]  %s78_s0, 3072, %s80_s30, [#allocation9], %s2349_s19, %s2349_s19, %s2350_s20  }
  0x12   :  { %2337 = dma.done.wait [#allocation3], 1024  }
  0x13   :  { %2338 = vsyncadd [#allocation3], 4294966272 }
  0x14   :  { %2339 = dma.done.wait [#allocation6], 5120  }
  0x15   :  { %2340 = vsyncadd [#allocation6], 4294962176 }
  0x16   :  { %2341 = dma.done.wait [#allocation9], 6144  }
  0x17   :  { %2342 = vsyncadd [#allocation9], 4294961152  ;;  %v138_v0 = vld [vmem:[#allocation5 + $0x70] sm:$0xff]  ;;  %v139_v1 = vld [vmem:[#allocation5 + $0x78] sm:$0xff]  ;;  %s1733_s16 = sshll.u32 %s2647_s8, 4  ;;  %s1734_s16 = int_to_ptr.hbm [resolvable:$true] %s1733_s16 }
  0x18   :  { %v136_v2 = vld [vmem:[#allocation5 + $0x60] sm:$0xff]  ;;  %v2418_v3 = vpack.c.bf16 %v139_v1, %v138_v0  ;;  %v137_v4 = vld [vmem:[#allocation5 + $0x68] sm:$0xff]  ;;  %v134_v6 = vld [vmem:[#allocation5 + $0x50] sm:$0xff] }
  0x19   :  { %v2421_v5 = vpack.c.bf16 %v137_v4, %v136_v2  ;;  %v135_v7 = vld [vmem:[#allocation5 + $0x58] sm:$0xff]  ;;  %v132_v9 = vld [vmem:[#allocation5 + $0x40] sm:$0xff]  ;;  %v133_v10 = vld [vmem:[#allocation5 + $0x48] sm:$0xff] }
  0x1a   :  { %2148 = vmatpush.bf16.msra.mxu3 %v2418_v3  ;;  %212 = vmatpush.bf16.msra.mxu0 %v2418_v3  ;;  %v2425_v8 = vpack.c.bf16 %v135_v7, %v134_v6  ;;  %v2429_v11 = vpack.c.bf16 %v133_v10, %v132_v9  ;;  %v130_v12 = vld [vmem:[#allocation5 + $0x30] sm:$0xff]  ;;  %v131_v13 = vld [vmem:[#allocation5 + $0x38] sm:$0xff]  ;;  %v128_v15 = vld [vmem:[#allocation5 + $0x20] sm:$0xff] }
  0x1b   :  { %v2433_v14 = vpack.c.bf16 %v131_v13, %v130_v12  ;;  %v129_v16 = vld [vmem:[#allocation5 + $0x28] sm:$0xff]  ;;  %v126_v18 = vld [vmem:[#allocation5 + $0x10] sm:$0xff]  ;;  %v127_v19 = vld [vmem:[#allocation5 + $0x18] sm:$0xff] }
  0x1c   :  { %v2437_v17 = vpack.c.bf16 %v129_v16, %v128_v15  ;;  %v2441_v20 = vpack.c.bf16 %v127_v19, %v126_v18  ;;  %v124_v21 = vld [vmem:[#allocation5] sm:$0xff]  ;;  %v125_v22 = vld [vmem:[#allocation5 + $0x8] sm:$0xff]  ;;  %v2448_v24 = vld [vmem:[#allocation2 + $0x10] sm:$0xff] }
  0x1d   :  { %v2445_v23 = vpack.c.bf16 %v125_v22, %v124_v21  ;;  %v2453_v25 = vld [vmem:[#allocation2] sm:$0xff]  ;;  %v2456_v26 = vld [vmem:[#allocation2 + $0x18] sm:$0xff]  ;;  %v2459_v27 = vld [vmem:[#allocation2 + $0x8] sm:$0xff] }
  0x1e   :  { %2149 = vmatpush.bf16.msra.mxu3 %v2421_v5  ;;  %213 = vmatpush.bf16.msra.mxu0 %v2421_v5  ;;  %v2462_v28 = vld [vmem:[#allocation2 + $0x20] sm:$0xff]  ;;  %v2465_v29 = vld [vmem:[#allocation2 + $0x28] sm:$0xff]  ;;  %v2083_v30 = vld [vmem:[#allocation7 + $0x38] sm:$0xff] }
  0x1f   :  { %v2091_v31 = vld [vmem:[#allocation7 + $0x78] sm:$0xff]  ;;  %2164 = vmatpush.bf16.msra.mxu2 %v2083_v30  ;;  %v2082_v32 = vld [vmem:[#allocation7 + $0x30] sm:$0xff]  ;;  %v2081_v34 = vld [vmem:[#allocation7 + $0x28] sm:$0xff] }
  0x20   :  { %2156 = vmatpush.bf16.msra.mxu1 %v2091_v31  ;;  %v2090_v33 = vld [vmem:[#allocation7 + $0x70] sm:$0xff]  ;;  %v2089_v35 = vld [vmem:[#allocation7 + $0x68] sm:$0xff]  ;;  %v2080_v36 = vld [vmem:[#allocation7 + $0x20] sm:$0xff] }
  0x21   :  { %v2088_v37 = vld [vmem:[#allocation7 + $0x60] sm:$0xff]  ;;  %v2468_v38 = vld [vmem:[#allocation2 + $0x30] sm:$0xff]  ;;  %v2079_v39 = vld [vmem:[#allocation7 + $0x18] sm:$0xff] }
  0x22   :  { %2150 = vmatpush.bf16.msra.mxu3 %v2425_v8  ;;  %214 = vmatpush.bf16.msra.mxu0 %v2425_v8  ;;  %v2087_v40 = vld [vmem:[#allocation7 + $0x58] sm:$0xff]  ;;  %v2078_v41 = vld [vmem:[#allocation7 + $0x10] sm:$0xff]  ;;  %v2077_v42 = vld [vmem:[#allocation7 + $0x8] sm:$0xff] }
  0x23   :  { %2165 = vmatpush.bf16.msra.mxu2 %v2082_v32  ;;  %v2471_v43 = vld [vmem:[#allocation2 + $0x38] sm:$0xff]  ;;  %v2086_v44 = vld [vmem:[#allocation7 + $0x50] sm:$0xff]  ;;  %v2076_v45 = vld [vmem:[#allocation7] sm:$0xff] }
  0x24   :  { %2157 = vmatpush.bf16.msra.mxu1 %v2090_v33  ;;  %v2085_v46 = vld [vmem:[#allocation7 + $0x48] sm:$0xff]  ;;  %v2084_v47 = vld [vmem:[#allocation7 + $0x40] sm:$0xff]  ;;  %v2098_v9 = vld [vmem:[#allocation7 + $0xb0] sm:$0xff] }
  0x25   :  { %v2097_v10 = vld [vmem:[#allocation7 + $0xa8] sm:$0xff]  ;;  %v2095_v12 = vld [vmem:[#allocation7 + $0x98] sm:$0xff]  ;;  %v2094_v13 = vld [vmem:[#allocation7 + $0x90] sm:$0xff] }
  0x26   :  { %2151 = vmatpush.bf16.msra.mxu3 %v2429_v11  ;;  %215 = vmatpush.bf16.msra.mxu0 %v2429_v11  ;;  %v2092_v15 = vld [vmem:[#allocation7 + $0x80] sm:$0xff] }
  0x27   :  { %2166 = vmatpush.bf16.msra.mxu2 %v2081_v34 }
  0x28   :  { %2158 = vmatpush.bf16.msra.mxu1 %v2089_v35 }
  0x2a   :  { %2152 = vmatpush.bf16.msra.mxu3 %v2433_v14  ;;  %216 = vmatpush.bf16.msra.mxu0 %v2433_v14 }
  0x2b   :  { %2167 = vmatpush.bf16.msra.mxu2 %v2080_v36 }
  0x2c   :  { %2159 = vmatpush.bf16.msra.mxu1 %v2088_v37 }
  0x2e   :  { %2153 = vmatpush.bf16.msra.mxu3 %v2437_v17  ;;  %217 = vmatpush.bf16.msra.mxu0 %v2437_v17 }
  0x2f   :  { %2168 = vmatpush.bf16.msra.mxu2 %v2079_v39 }
  0x30   :  { %2160 = vmatpush.bf16.msra.mxu1 %v2087_v40 }
  0x32   :  { %2154 = vmatpush.bf16.msra.mxu3 %v2441_v20  ;;  %218 = vmatpush.bf16.msra.mxu0 %v2441_v20 }
  0x33   :  { %2169 = vmatpush.bf16.msra.mxu2 %v2078_v41 }
  0x34   :  { %2161 = vmatpush.bf16.msra.mxu1 %v2086_v44 }
  0x36   :  { %2155 = vmatpush.bf16.msra.mxu3 %v2445_v23  ;;  %219 = vmatpush.bf16.msra.mxu0 %v2445_v23 }
  0x37   :  { %2170 = vmatpush.bf16.msra.mxu2 %v2077_v42 }
  0x38   :  { %2162 = vmatpush.bf16.msra.mxu1 %v2085_v46 }
  0x39   :  { %230 = vmatmul.bf16.vlgmr.msra.gmra.mxu3 %v2448_v24  ;;  %220 = vmatmul.bf16.vlgmr.msra.gmra.mxu0 %v2453_v25 }
  0x3a   :  { %333 = vmatpush.bf16.msrb.mxu0 %v2091_v31 }
  0x3b   :  { %2171 = vmatpush.bf16.msra.mxu2 %v2076_v45 }
  0x3c   :  { %2163 = vmatpush.bf16.msra.mxu1 %v2084_v47 }
  0x3e   :  { %334 = vmatpush.bf16.msrb.mxu0 %v2090_v33  ;;  %448 = vmatmul.bf16.vlgmr.msra.gmra.mxu2 %v2437_v17 }
  0x42   :  { %335 = vmatpush.bf16.msrb.mxu0 %v2089_v35 }
  0x46   :  { %336 = vmatpush.bf16.msrb.mxu0 %v2088_v37 }
  0x49   :  { %235 = vmatmul.bf16.gmra.mxu3 %v2456_v26  ;;  %225 = vmatmul.bf16.gmra.mxu0 %v2459_v27 }
  0x4a   :  { %337 = vmatpush.bf16.msrb.mxu0 %v2087_v40 }
  0x4e   :  { %338 = vmatpush.bf16.msrb.mxu0 %v2086_v44  ;;  %453 = vmatmul.bf16.gmra.mxu2 %v2433_v14  ;;  %v2093_v14 = vld [vmem:[#allocation7 + $0x88] sm:$0xff] }
  0x52   :  { %339 = vmatpush.bf16.msrb.mxu0 %v2085_v46 }
  0x56   :  { %340 = vmatpush.bf16.msrb.mxu0 %v2084_v47  ;;  %v2106_v47 = vld [vmem:[#allocation8 + $0x30] sm:$0xff] }
  0x59   :  { %240 = vmatmul.bf16.gmra.mxu3 %v2462_v28 }
  0x5a   :  { %430 = vmatpush.bf16.msra.mxu0 %v2083_v30 }
  0x5e   :  { %431 = vmatpush.bf16.msra.mxu0 %v2082_v32  ;;  %458 = vmatmul.bf16.gmra.mxu2 %v2429_v11  ;;  %v2096_v11 = vld [vmem:[#allocation7 + $0xa0] sm:$0xff] }
  0x62   :  { %432 = vmatpush.bf16.msra.mxu0 %v2081_v34 }
  0x66   :  { %433 = vmatpush.bf16.msra.mxu0 %v2080_v36 }
  0x69   :  { %245 = vmatmul.bf16.gmra.mxu3 %v2465_v29 }
  0x6a   :  { %434 = vmatpush.bf16.msra.mxu0 %v2079_v39 }
  0x6e   :  { %435 = vmatpush.bf16.msra.mxu0 %v2078_v41  ;;  %463 = vmatmul.bf16.gmra.mxu2 %v2425_v8 }
  0x72   :  { %436 = vmatpush.bf16.msra.mxu0 %v2077_v42 }
  0x76   :  { %437 = vmatpush.bf16.msra.mxu0 %v2076_v45  ;;  %v2107_v45 = vld [vmem:[#allocation8 + $0x38] sm:$0xff] }
  0x79   :  { %250 = vmatmul.bf16.gmra.mxu3 %v2468_v38 }
  0x7e   :  { %468 = vmatmul.bf16.gmra.mxu2 %v2421_v5 }
  0x89   :  { %255 = vmatmul.bf16.gmra.mxu3 %v2471_v43 }
  0x8e   :  { %473 = vmatmul.bf16.gmra.mxu2 %v2418_v3  ;;  %v2099_v3 = vld [vmem:[#allocation7 + $0xb8] sm:$0xff] }
  0xb6   :  { %v221_v49 = vpop.f32.mrf.mxu0 }
  0xbc   :  { %v231_v48 = vpop.f32.mrf.mxu3 }
  0xbe   :  { %v223_v52 = vpop.f32.mrf.mxu0 }
  0xbf   :  { %v261_v53 = vpack.c.bf16 %v223_v52, %v221_v49 }
  0xc1   :  { %341 = vmatmul.bf16.vlgmr.msrb.gmra.mxu0 %v261_v53 }
  0xc2   :  { %600 = vmatpush.bf16.msrb.mxu0 %v2099_v3 }
  0xc4   :  { %v233_v50 = vpop.f32.mrf.mxu3 }
  0xc5   :  { %v263_v51 = vpack.c.bf16 %v233_v50, %v231_v48  ;;  %v2105_v48 = vld [vmem:[#allocation8 + $0x28] sm:$0xff] }
  0xc6   :  { %v226_v55 = vpop.f32.mrf.mxu0  ;;  %601 = vmatpush.bf16.msrb.mxu0 %v2098_v9 }
  0xc7   :  { %351 = vmatmul.bf16.vlgmr.msra.gmra.mxu1 %v263_v51 }
  0xca   :  { %602 = vmatpush.bf16.msrb.mxu0 %v2097_v10 }
  0xcc   :  { %v236_v54 = vpop.f32.mrf.mxu3 }
  0xce   :  { %v228_v58 = vpop.f32.mrf.mxu0  ;;  %603 = vmatpush.bf16.msrb.mxu0 %v2096_v11 }
  0xcf   :  { %v262_v60 = vpack.c.bf16 %v228_v58, %v226_v55  ;;  %v2101_v58 = vld [vmem:[#allocation8 + $0x8] sm:$0xff] }
  0xd1   :  { %346 = vmatmul.bf16.gmra.mxu0 %v262_v60 }
  0xd2   :  { %604 = vmatpush.bf16.msrb.mxu0 %v2095_v12 }
  0xd4   :  { %v238_v56 = vpop.f32.mrf.mxu3 }
  0xd5   :  { %v264_v57 = vpack.c.bf16 %v238_v56, %v236_v54  ;;  %v2102_v56 = vld [vmem:[#allocation8 + $0x10] sm:$0xff] }
  0xd6   :  { %605 = vmatpush.bf16.msrb.mxu0 %v2094_v13 }
  0xd7   :  { %356 = vmatmul.bf16.gmra.mxu1 %v264_v57 }
  0xda   :  { %606 = vmatpush.bf16.msrb.mxu0 %v2093_v14 }
  0xdc   :  { %v241_v59 = vpop.f32.mrf.mxu3 }
  0xde   :  { %607 = vmatpush.bf16.msrb.mxu0 %v2092_v15 }
  0xe1   :  { %438 = vmatmul.bf16.vlgmr.msra.gmra.mxu0 %v2445_v23 }
  0xe4   :  { %v243_v61 = vpop.f32.mrf.mxu3 }
  0xe5   :  { %v265_v62 = vpack.c.bf16 %v243_v61, %v241_v59  ;;  %v2100_v59 = vld [vmem:[#allocation8] sm:$0xff] }
  0xe7   :  { %361 = vmatmul.bf16.gmra.mxu1 %v265_v62 }
  0xec   :  { %v246_v63 = vpop.f32.mrf.mxu3 }
  0xf1   :  { %443 = vmatmul.bf16.gmra.mxu0 %v2441_v20 }
  0xf4   :  { %v248_v0 = vpop.f32.mrf.mxu3 }
  0xf5   :  { %v266_v1 = vpack.c.bf16 %v248_v0, %v246_v63 }
  0xf7   :  { %366 = vmatmul.bf16.gmra.mxu1 %v266_v1 }
  0xfc   :  { %v251_v2 = vpop.f32.mrf.mxu3 }
 0x104   :  { %v253_v4 = vpop.f32.mrf.mxu3 }
 0x105   :  { %v267_v6 = vpack.c.bf16 %v253_v4, %v251_v2  ;;  %v449_v2 = vpop.f32.mrf.mxu2 }
 0x107   :  { %371 = vmatmul.bf16.gmra.mxu1 %v267_v6 }
 0x10c   :  { %v256_v7 = vpop.f32.mrf.mxu3 }
 0x10d   :  { %v451_v13 = vpop.f32.mrf.mxu2 }
 0x114   :  { %v258_v8 = vpop.f32.mrf.mxu3 }
 0x115   :  { %v268_v5 = vpack.c.bf16 %v258_v8, %v256_v7 }
 0x117   :  { %376 = vmatmul.bf16.gmra.mxu1 %v268_v5  ;;  %479 = vmatpush.bf16.msrb.mxu3 %v268_v5 }
 0x11b   :  { %480 = vmatpush.bf16.msrb.mxu3 %v267_v6  ;;  %v2493_v6 = vld [vmem:[%s2642_s3] ss:$0 sm:$0xff] }
 0x11f   :  { %481 = vmatpush.bf16.msrb.mxu3 %v266_v1 }
 0x123   :  { %482 = vmatpush.bf16.msrb.mxu3 %v265_v62 }
 0x127   :  { %483 = vmatpush.bf16.msrb.mxu3 %v264_v57 }
 0x12b   :  { %484 = vmatpush.bf16.msrb.mxu3 %v263_v51  ;;  %v2104_v51 = vld [vmem:[#allocation8 + $0x20] sm:$0xff] }
 0x12f   :  { %485 = vmatpush.bf16.msrb.mxu3 %v262_v60 }
 0x133   :  { %486 = vmatpush.bf16.msrb.mxu3 %v261_v53  ;;  %v2103_v53 = vld [vmem:[#allocation8 + $0x18] sm:$0xff] }
 0x136   :  { %487 = vmatmul.bf16.vlgmr.msrb.gmra.mxu3 %v2453_v25 }
 0x137   :  { %943 = vmatpush.bf16.msra.mxu3 %v2107_v45 }
 0x13b   :  { %944 = vmatpush.bf16.msra.mxu3 %v2106_v47 }
 0x13e   :  { %v342_v34 = vpop.f32.mrf.mxu0 }
 0x13f   :  { %945 = vmatpush.bf16.msra.mxu3 %v2105_v48 }
 0x143   :  { %946 = vmatpush.bf16.msra.mxu3 %v2104_v51 }
 0x144   :  { %v352_v7 = vpop.f32.mrf.mxu1 }
 0x146   :  { %492 = vmatmul.bf16.gmra.mxu3 %v2459_v27  ;;  %v344_v36 = vpop.f32.mrf.mxu0 }
 0x147   :  { %947 = vmatpush.bf16.msra.mxu3 %v2103_v53 }
 0x14b   :  { %948 = vmatpush.bf16.msra.mxu3 %v2102_v56 }
 0x14c   :  { %v354_v15 = vpop.f32.mrf.mxu1 }
 0x14e   :  { %v347_v40 = vpop.f32.mrf.mxu0 }
 0x14f   :  { %949 = vmatpush.bf16.msra.mxu3 %v2101_v58 }
 0x153   :  { %950 = vmatpush.bf16.msra.mxu3 %v2100_v59 }
 0x156   :  { %497 = vmatmul.bf16.gmra.mxu3 %v2448_v24  ;;  %v349_v42 = vpop.f32.mrf.mxu0 }
 0x15e   :  { %v439_v50 = vpop.f32.mrf.mxu0 }
 0x15f   :  { %v440_v1 = vadd.f32 %v439_v50, %v342_v34 }
 0x166   :  { %502 = vmatmul.bf16.gmra.mxu3 %v2456_v26  ;;  %v441_v55 = vpop.f32.mrf.mxu0 }
 0x167   :  { %v442_v8 = vadd.f32 %v441_v55, %v344_v36  ;;  %v450_v36 = vadd.f32 %v449_v2, %v352_v7 }
 0x16e   :  { %v444_v60 = vpop.f32.mrf.mxu0 }
 0x176   :  { %507 = vmatmul.bf16.gmra.mxu3 %v2462_v28  ;;  %v446_v63 = vpop.f32.mrf.mxu0 }
 0x186   :  { %512 = vmatmul.bf16.gmra.mxu3 %v2465_v29 }
 0x196   :  { %517 = vmatmul.bf16.gmra.mxu3 %v2468_v38 }
 0x1a6   :  { %522 = vmatmul.bf16.gmra.mxu3 %v2471_v43 }
 0x1b9   :  { %v488_v16 = vpop.f32.mrf.mxu3 }
 0x1c1   :  { %v490_v17 = vpop.f32.mrf.mxu3 }
 0x1c2   :  { %v528_v18 = vpack.c.bf16 %v490_v17, %v488_v16  ;;  %v445_v17 = vadd.f32 %v444_v60, %v347_v40 }
 0x1c4   :  { %608 = vmatmul.bf16.vlgmr.msrb.gmra.mxu0 %v528_v18 }
 0x1c9   :  { %v493_v19 = vpop.f32.mrf.mxu3 }
 0x1d1   :  { %v495_v20 = vpop.f32.mrf.mxu3 }
 0x1d2   :  { %v529_v21 = vpack.c.bf16 %v495_v20, %v493_v19  ;;  %v447_v19 = vadd.f32 %v446_v63, %v349_v42 }
 0x1d4   :  { %613 = vmatmul.bf16.gmra.mxu0 %v529_v21  ;;  %v454_v21 = vpop.f32.mrf.mxu2 }
 0x1d9   :  { %v498_v22 = vpop.f32.mrf.mxu3 }
 0x1e1   :  { %v500_v23 = vpop.f32.mrf.mxu3 }
 0x1e2   :  { %v530_v30 = vpack.c.bf16 %v500_v23, %v498_v22 }
 0x1e4   :  { %618 = vmatmul.bf16.gmra.mxu0 %v530_v30  ;;  %v357_v30 = vpop.f32.mrf.mxu1 }
 0x1e5   :  { %v455_v53 = vadd.f32 %v454_v21, %v357_v30 }
 0x1e9   :  { %v503_v31 = vpop.f32.mrf.mxu3 }
 0x1f1   :  { %v505_v32 = vpop.f32.mrf.mxu3 }
 0x1f2   :  { %v531_v33 = vpack.c.bf16 %v505_v32, %v503_v31 }
 0x1f4   :  { %623 = vmatmul.bf16.gmra.mxu0 %v531_v33 }
 0x1f9   :  { %v508_v35 = vpop.f32.mrf.mxu3 }
 0x201   :  { %v510_v37 = vpop.f32.mrf.mxu3 }
 0x202   :  { %v532_v39 = vpack.c.bf16 %v510_v37, %v508_v35  ;;  %v456_v37 = vpop.f32.mrf.mxu2 }
 0x204   :  { %628 = vmatmul.bf16.gmra.mxu0 %v532_v39  ;;  %v359_v39 = vpop.f32.mrf.mxu1 }
 0x205   :  { %v457_v55 = vadd.f32 %v456_v37, %v359_v39 }
 0x209   :  { %v513_v41 = vpop.f32.mrf.mxu3 }
 0x20a   :  { %v459_v47 = vpop.f32.mrf.mxu2 }
 0x20c   :  { %v362_v50 = vpop.f32.mrf.mxu1 }
 0x20d   :  { %v460_v7 = vadd.f32 %v459_v47, %v362_v50 }
 0x211   :  { %v515_v44 = vpop.f32.mrf.mxu3 }
 0x212   :  { %v533_v46 = vpack.c.bf16 %v515_v44, %v513_v41  ;;  %v452_v41 = vadd.f32 %v451_v13, %v354_v15  ;;  %v461_v56 = vpop.f32.mrf.mxu2 }
 0x214   :  { %633 = vmatmul.bf16.gmra.mxu0 %v533_v46 }
 0x219   :  { %v518_v49 = vpop.f32.mrf.mxu3 }
 0x21a   :  { %v464_v2 = vpop.f32.mrf.mxu2 }
 0x221   :  { %v520_v52 = vpop.f32.mrf.mxu3 }
 0x222   :  { %v534_v54 = vpack.c.bf16 %v520_v52, %v518_v49 }
 0x224   :  { %638 = vmatmul.bf16.gmra.mxu0 %v534_v54 }
 0x229   :  { %v523_v57 = vpop.f32.mrf.mxu3 }
 0x231   :  { %v525_v61 = vpop.f32.mrf.mxu3 }
 0x232   :  { %v535_v62 = vpack.c.bf16 %v525_v61, %v523_v57  ;;  %v364_v57 = vpop.f32.mrf.mxu1 }
 0x234   :  { %643 = vmatmul.bf16.gmra.mxu0 %v535_v62 }
 0x241   :  { %v609_v0 = vpop.f32.mrf.mxu0 }
 0x242   :  { %v649_v4 = vadd.f32 %v609_v0, %v440_v1 }
 0x244   :  { %v669_v3 = vadd.f32 %v2493_v6, %v649_v4  ;;  %v367_v4 = vpop.f32.mrf.mxu1 }
 0x246   :  { %v685_v11 = vmax.f32 %v669_v3, 0.0 }
 0x249   :  { %v611_v5 = vpop.f32.mrf.mxu0 }
 0x24a   :  { %v650_v9 = vadd.f32 %v611_v5, %v442_v8  ;;  %v462_v5 = vadd.f32 %v461_v56, %v364_v57 }
 0x24c   :  { %v670_v10 = vadd.f32 %v2493_v6, %v650_v9  ;;  %v369_v13 = vpop.f32.mrf.mxu1 }
 0x24e   :  { %v686_v12 = vmax.f32 %v670_v10, 0.0 }
 0x250   :  { %v2497_v14 = vpack.c.bf16 %v686_v12, %v685_v11  ;;  %v466_v11 = vpop.f32.mrf.mxu2 }
 0x251   :  { %v614_v16 = vpop.f32.mrf.mxu0 }
 0x252   :  { %951 = vmatmul.bf16.vlgmr.msra.gmra.mxu3 %v2497_v14  ;;  %v651_v18 = vadd.f32 %v614_v16, %v445_v17 }
 0x254   :  { %v671_v22 = vadd.f32 %v2493_v6, %v651_v18 }
 0x256   :  { %v687_v32 = vmax.f32 %v671_v22, 0.0  ;;  %v372_v22 = vpop.f32.mrf.mxu1 }
 0x259   :  { %v616_v20 = vpop.f32.mrf.mxu0 }
 0x25a   :  { %v652_v23 = vadd.f32 %v616_v20, %v447_v19  ;;  %v465_v19 = vadd.f32 %v464_v2, %v367_v4  ;;  %v469_v20 = vpop.f32.mrf.mxu2 }
 0x25c   :  { %v672_v31 = vadd.f32 %v2493_v6, %v652_v23  ;;  %v467_v23 = vadd.f32 %v466_v11, %v369_v13 }
 0x25e   :  { %v688_v33 = vmax.f32 %v672_v31, 0.0 }
 0x260   :  { %v2502_v34 = vpack.c.bf16 %v688_v33, %v687_v32 }
 0x261   :  { %v619_v35 = vpop.f32.mrf.mxu0 }
 0x262   :  { %956 = vmatmul.bf16.gmra.mxu3 %v2502_v34  ;;  %v653_v40 = vadd.f32 %v619_v35, %v450_v36  ;;  %v471_v37 = vpop.f32.mrf.mxu2 }
 0x264   :  { %v673_v44 = vadd.f32 %v2493_v6, %v653_v40  ;;  %v374_v40 = vpop.f32.mrf.mxu1 }
 0x266   :  { %v689_v48 = vmax.f32 %v673_v44, 0.0 }
 0x269   :  { %v621_v42 = vpop.f32.mrf.mxu0 }
 0x26a   :  { %v654_v45 = vadd.f32 %v621_v42, %v452_v41  ;;  %v470_v42 = vadd.f32 %v469_v20, %v372_v22  ;;  %v474_v50 = vpop.f32.mrf.mxu2 }
 0x26c   :  { %v674_v46 = vadd.f32 %v2493_v6, %v654_v45  ;;  %v472_v45 = vadd.f32 %v471_v37, %v374_v40 }
 0x26e   :  { %v690_v49 = vmax.f32 %v674_v46, 0.0 }
 0x270   :  { %v2507_v51 = vpack.c.bf16 %v690_v49, %v689_v48  ;;  %v377_v49 = vpop.f32.mrf.mxu1 }
 0x271   :  { %v624_v52 = vpop.f32.mrf.mxu0  ;;  %v475_v57 = vadd.f32 %v474_v50, %v377_v49 }
 0x272   :  { %961 = vmatmul.bf16.gmra.mxu3 %v2507_v51  ;;  %v655_v54 = vadd.f32 %v624_v52, %v455_v53 }
 0x274   :  { %v675_v59 = vadd.f32 %v2493_v6, %v655_v54 }
 0x276   :  { %v691_v62 = vmax.f32 %v675_v59, 0.0  ;;  %v476_v59 = vpop.f32.mrf.mxu2 }
 0x279   :  { %v626_v58 = vpop.f32.mrf.mxu0 }
 0x27a   :  { %v656_v60 = vadd.f32 %v626_v58, %v457_v55  ;;  %v379_v58 = vpop.f32.mrf.mxu1 }
 0x27c   :  { %v676_v61 = vadd.f32 %v2493_v6, %v656_v60 }
 0x27e   :  { %v692_v63 = vmax.f32 %v676_v61, 0.0  ;;  %v477_v61 = vadd.f32 %v476_v59, %v379_v58 }
 0x280   :  { %v2512_v0 = vpack.c.bf16 %v692_v63, %v691_v62 }
 0x281   :  { %v629_v1 = vpop.f32.mrf.mxu0 }
 0x282   :  { %966 = vmatmul.bf16.gmra.mxu3 %v2512_v0  ;;  %v657_v8 = vadd.f32 %v629_v1, %v460_v7 }
 0x284   :  { %v677_v9 = vadd.f32 %v2493_v6, %v657_v8 }
 0x286   :  { %v693_v15 = vmax.f32 %v677_v9, 0.0  ;;  %v2108_v9 = vld [vmem:[#allocation8 + $0x40] sm:$0xff] }
 0x289   :  { %v631_v3 = vpop.f32.mrf.mxu0 }
 0x28a   :  { %v658_v10 = vadd.f32 %v631_v3, %v462_v5  ;;  %v2114_v5 = vld [vmem:[#allocation8 + $0x70] sm:$0xff]  ;;  %v2109_v3 = vld [vmem:[#allocation8 + $0x48] sm:$0xff] }
 0x28c   :  { %v678_v12 = vadd.f32 %v2493_v6, %v658_v10 }
 0x28e   :  { %v694_v16 = vmax.f32 %v678_v12, 0.0 }
 0x290   :  { %v705_v17 = vpack.c.bf16 %v694_v16, %v693_v15 }
 0x291   :  { %v634_v18 = vpop.f32.mrf.mxu0 }
 0x292   :  { %971 = vmatmul.bf16.gmra.mxu3 %v705_v17  ;;  %v659_v21 = vadd.f32 %v634_v18, %v465_v19 }
 0x294   :  { %v679_v31 = vadd.f32 %v2493_v6, %v659_v21 }
 0x296   :  { %v695_v35 = vmax.f32 %v679_v31, 0.0 }
 0x299   :  { %v636_v30 = vpop.f32.mrf.mxu0 }
 0x29a   :  { %v660_v32 = vadd.f32 %v636_v30, %v467_v23 }
 0x29c   :  { %v680_v33 = vadd.f32 %v2493_v6, %v660_v32 }
 0x29e   :  { %v696_v36 = vmax.f32 %v680_v33, 0.0 }
 0x2a0   :  { %v706_v39 = vpack.c.bf16 %v696_v36, %v695_v35 }
 0x2a1   :  { %v639_v41 = vpop.f32.mrf.mxu0 }
 0x2a2   :  { %976 = vmatmul.bf16.gmra.mxu3 %v706_v39  ;;  %v661_v44 = vadd.f32 %v639_v41, %v470_v42 }
 0x2a4   :  { %v681_v47 = vadd.f32 %v2493_v6, %v661_v44  ;;  %v2123_v44 = vld [vmem:[#allocation8 + $0xb8] sm:$0xff] }
 0x2a6   :  { %v697_v53 = vmax.f32 %v681_v47, 0.0  ;;  %v2120_v47 = vld [vmem:[#allocation8 + $0xa0] sm:$0xff] }
 0x2a9   :  { %v641_v46 = vpop.f32.mrf.mxu0 }
 0x2aa   :  { %v662_v48 = vadd.f32 %v641_v46, %v472_v45  ;;  %v2122_v45 = vld [vmem:[#allocation8 + $0xb0] sm:$0xff]  ;;  %v2121_v46 = vld [vmem:[#allocation8 + $0xa8] sm:$0xff] }
 0x2ac   :  { %v682_v52 = vadd.f32 %v2493_v6, %v662_v48  ;;  %v2119_v48 = vld [vmem:[#allocation8 + $0x98] sm:$0xff] }
 0x2ae   :  { %v698_v54 = vmax.f32 %v682_v52, 0.0 }
 0x2b0   :  { %v707_v55 = vpack.c.bf16 %v698_v54, %v697_v53 }
 0x2b1   :  { %v644_v56 = vpop.f32.mrf.mxu0 }
 0x2b2   :  { %981 = vmatmul.bf16.gmra.mxu3 %v707_v55  ;;  %v663_v60 = vadd.f32 %v644_v56, %v475_v57 }
 0x2b4   :  { %v683_v63 = vadd.f32 %v2493_v6, %v663_v60 }
 0x2b6   :  { %v699_v4 = vmax.f32 %v683_v63, 0.0 }
 0x2b9   :  { %v646_v62 = vpop.f32.mrf.mxu0 }
 0x2ba   :  { %v664_v1 = vadd.f32 %v646_v62, %v477_v61  ;;  %v2131_v62 = vld [vmem:[#allocation10 + $0x38] sm:$0xff] }
 0x2bc   :  { %v684_v2 = vadd.f32 %v2493_v6, %v664_v1  ;;  %v2115_v6 = vld [vmem:[#allocation8 + $0x78] sm:$0xff]  ;;  %v2130_v1 = vld [vmem:[#allocation10 + $0x30] sm:$0xff] }
 0x2bd   :  { %846 = vmatpush.bf16.msrb.mxu2 %v2115_v6 }
 0x2be   :  { %v700_v7 = vmax.f32 %v684_v2, 0.0  ;;  %v2129_v2 = vld [vmem:[#allocation10 + $0x28] sm:$0xff] }
 0x2c0   :  { %v708_v8 = vpack.c.bf16 %v700_v7, %v699_v4  ;;  %v2128_v7 = vld [vmem:[#allocation10 + $0x20] sm:$0xff] }
 0x2c1   :  { %847 = vmatpush.bf16.msrb.mxu2 %v2114_v5 }
 0x2c2   :  { %725 = vmatpush.bf16.msrb.mxu1 %v708_v8  ;;  %986 = vmatmul.bf16.gmra.mxu3 %v708_v8 }
 0x2c6   :  { %726 = vmatpush.bf16.msrb.mxu1 %v707_v55 }
 0x2ca   :  { %727 = vmatpush.bf16.msrb.mxu1 %v706_v39 }
 0x2ce   :  { %728 = vmatpush.bf16.msrb.mxu1 %v705_v17 }
 0x2d2   :  { %729 = vmatpush.bf16.msrb.mxu1 %v2512_v0  ;;  %v2113_v0 = vld [vmem:[#allocation8 + $0x68] sm:$0xff] }
 0x2d3   :  { %848 = vmatpush.bf16.msrb.mxu2 %v2113_v0  ;;  %v2127_v0 = vld [vmem:[#allocation10 + $0x18] sm:$0xff] }
 0x2d5   :  { %v952_v6 = vpop.f32.mrf.mxu3 }
 0x2d6   :  { %730 = vmatpush.bf16.msrb.mxu1 %v2507_v51  ;;  %v2110_v51 = vld [vmem:[#allocation8 + $0x50] sm:$0xff] }
 0x2da   :  { %731 = vmatpush.bf16.msrb.mxu1 %v2502_v34  ;;  %v2112_v34 = vld [vmem:[#allocation8 + $0x60] sm:$0xff] }
 0x2db   :  { %849 = vmatpush.bf16.msrb.mxu2 %v2112_v34 }
 0x2de   :  { %732 = vmatpush.bf16.msrb.mxu1 %v2497_v14  ;;  %v2111_v14 = vld [vmem:[#allocation8 + $0x58] sm:$0xff] }
 0x2df   :  { %850 = vmatpush.bf16.msrb.mxu2 %v2111_v14  ;;  %v2126_v14 = vld [vmem:[#allocation10 + $0x10] sm:$0xff] }
 0x2e1   :  { %733 = vmatmul.bf16.vlgmr.msrb.gmra.mxu1 %v2453_v25 }
 0x2e2   :  { %1113 = vmatpush.bf16.msra.mxu1 %v2123_v44 }
 0x2e3   :  { %851 = vmatpush.bf16.msrb.mxu2 %v2110_v51 }
 0x2e6   :  { %1114 = vmatpush.bf16.msra.mxu1 %v2122_v45 }
 0x2e7   :  { %852 = vmatpush.bf16.msrb.mxu2 %v2109_v3 }
 0x2ea   :  { %1115 = vmatpush.bf16.msra.mxu1 %v2121_v46 }
 0x2eb   :  { %853 = vmatpush.bf16.msrb.mxu2 %v2108_v9  ;;  %v2125_v9 = vld [vmem:[#allocation10 + $0x8] sm:$0xff] }
 0x2ee   :  { %1116 = vmatpush.bf16.msra.mxu1 %v2120_v47 }
 0x2f1   :  { %738 = vmatmul.bf16.gmra.mxu1 %v2459_v27 }
 0x2f2   :  { %1117 = vmatpush.bf16.msra.mxu1 %v2119_v48 }
 0x301   :  { %743 = vmatmul.bf16.gmra.mxu1 %v2448_v24 }
 0x311   :  { %748 = vmatmul.bf16.gmra.mxu1 %v2456_v26 }
 0x321   :  { %753 = vmatmul.bf16.gmra.mxu1 %v2462_v28 }
 0x331   :  { %758 = vmatmul.bf16.gmra.mxu1 %v2465_v29 }
 0x341   :  { %763 = vmatmul.bf16.gmra.mxu1 %v2468_v38 }
 0x351   :  { %768 = vmatmul.bf16.gmra.mxu1 %v2471_v43 }
 0x35e   :  { %v734_v10 = vpop.f32.mrf.mxu1 }
 0x366   :  { %v736_v11 = vpop.f32.mrf.mxu1 }
 0x367   :  { %v774_v12 = vpack.c.bf16 %v736_v11, %v734_v10  ;;  %v954_v10 = vpop.f32.mrf.mxu3  ;;  %v2124_v11 = vld [vmem:[#allocation10] sm:$0xff] }
 0x369   :  { %854 = vmatmul.bf16.vlgmr.msrb.gmra.mxu2 %v774_v12 }
 0x36e   :  { %v739_v13 = vpop.f32.mrf.mxu1 }
 0x376   :  { %v741_v15 = vpop.f32.mrf.mxu1 }
 0x377   :  { %v775_v16 = vpack.c.bf16 %v741_v15, %v739_v13 }
 0x379   :  { %859 = vmatmul.bf16.gmra.mxu2 %v775_v16 }
 0x37e   :  { %v744_v17 = vpop.f32.mrf.mxu1 }
 0x386   :  { %v746_v18 = vpop.f32.mrf.mxu1 }
 0x387   :  { %v776_v19 = vpack.c.bf16 %v746_v18, %v744_v17 }
 0x389   :  { %864 = vmatmul.bf16.gmra.mxu2 %v776_v19 }
 0x38e   :  { %v749_v20 = vpop.f32.mrf.mxu1 }
 0x396   :  { %v751_v21 = vpop.f32.mrf.mxu1 }
 0x397   :  { %v777_v22 = vpack.c.bf16 %v751_v21, %v749_v20 }
 0x399   :  { %869 = vmatmul.bf16.gmra.mxu2 %v777_v22 }
 0x39e   :  { %v754_v23 = vpop.f32.mrf.mxu1 }
 0x3a6   :  { %v756_v30 = vpop.f32.mrf.mxu1 }
 0x3a7   :  { %v778_v31 = vpack.c.bf16 %v756_v30, %v754_v23 }
 0x3a9   :  { %874 = vmatmul.bf16.gmra.mxu2 %v778_v31 }
 0x3ae   :  { %v759_v32 = vpop.f32.mrf.mxu1 }
 0x3b6   :  { %v761_v33 = vpop.f32.mrf.mxu1 }
 0x3b7   :  { %v779_v35 = vpack.c.bf16 %v761_v33, %v759_v32 }
 0x3b9   :  { %879 = vmatmul.bf16.gmra.mxu2 %v779_v35 }
 0x3be   :  { %v764_v36 = vpop.f32.mrf.mxu1 }
 0x3c6   :  { %v766_v37 = vpop.f32.mrf.mxu1 }
 0x3c7   :  { %v780_v39 = vpack.c.bf16 %v766_v37, %v764_v36 }
 0x3c9   :  { %884 = vmatmul.bf16.gmra.mxu2 %v780_v39 }
 0x3ce   :  { %v769_v40 = vpop.f32.mrf.mxu1 }
 0x3d6   :  { %v771_v41 = vpop.f32.mrf.mxu1 }
 0x3d7   :  { %v781_v42 = vpack.c.bf16 %v771_v41, %v769_v40 }
 0x3d9   :  { %889 = vmatmul.bf16.gmra.mxu2 %v781_v42  ;;  %992 = vmatpush.bf16.msra.mxu0 %v781_v42 }
 0x3dd   :  { %993 = vmatpush.bf16.msra.mxu0 %v780_v39 }
 0x3e1   :  { %994 = vmatpush.bf16.msra.mxu0 %v779_v35 }
 0x3e5   :  { %995 = vmatpush.bf16.msra.mxu0 %v778_v31 }
 0x3e9   :  { %996 = vmatpush.bf16.msra.mxu0 %v777_v22  ;;  %v2546_v22 = vld [vmem:[%s2644_s5] ss:$0 sm:$0xff] }
 0x3ec   :  { %v855_v8 = vpop.f32.mrf.mxu2 }
 0x3ed   :  { %997 = vmatpush.bf16.msra.mxu0 %v776_v19  ;;  %v953_v20 = vadd.f32 %v952_v6, %v855_v8 }
 0x3f1   :  { %998 = vmatpush.bf16.msra.mxu0 %v775_v16  ;;  %v957_v16 = vpop.f32.mrf.mxu3 }
 0x3f4   :  { %v857_v51 = vpop.f32.mrf.mxu2 }
 0x3f5   :  { %999 = vmatpush.bf16.msra.mxu0 %v774_v12  ;;  %v955_v30 = vadd.f32 %v954_v10, %v857_v51 }
 0x3f8   :  { %1000 = vmatmul.bf16.vlgmr.msra.gmra.mxu0 %v2453_v25  ;;  %v2118_v25 = vld [vmem:[#allocation8 + $0x90] sm:$0xff] }
 0x3f9   :  { %1118 = vmatpush.bf16.msra.mxu1 %v2118_v25  ;;  %1456 = vmatpush.bf16.msrb.mxu0 %v2131_v62  ;;  %v959_v18 = vpop.f32.mrf.mxu3 }
 0x3fc   :  { %v860_v15 = vpop.f32.mrf.mxu2 }
 0x3fd   :  { %1457 = vmatpush.bf16.msrb.mxu0 %v2130_v1  ;;  %v958_v45 = vadd.f32 %v957_v16, %v860_v15 }
 0x401   :  { %1458 = vmatpush.bf16.msrb.mxu0 %v2129_v2  ;;  %v962_v31 = vpop.f32.mrf.mxu3 }
 0x404   :  { %v862_v17 = vpop.f32.mrf.mxu2 }
 0x405   :  { %1459 = vmatpush.bf16.msrb.mxu0 %v2128_v7  ;;  %v960_v47 = vadd.f32 %v959_v18, %v862_v17 }
 0x408   :  { %1005 = vmatmul.bf16.gmra.mxu0 %v2459_v27  ;;  %v2117_v27 = vld [vmem:[#allocation8 + $0x88] sm:$0xff] }
 0x409   :  { %1119 = vmatpush.bf16.msra.mxu1 %v2117_v27  ;;  %1460 = vmatpush.bf16.msrb.mxu0 %v2127_v0  ;;  %v964_v44 = vpop.f32.mrf.mxu3 }
 0x40c   :  { %v865_v23 = vpop.f32.mrf.mxu2 }
 0x40d   :  { %1461 = vmatpush.bf16.msrb.mxu0 %v2126_v14 }
 0x411   :  { %1462 = vmatpush.bf16.msrb.mxu0 %v2125_v9 }
 0x414   :  { %v867_v41 = vpop.f32.mrf.mxu2 }
 0x415   :  { %1463 = vmatpush.bf16.msrb.mxu0 %v2124_v11 }
 0x418   :  { %1010 = vmatmul.bf16.gmra.mxu0 %v2448_v24  ;;  %v2116_v24 = vld [vmem:[#allocation8 + $0x80] sm:$0xff] }
 0x419   :  { %1120 = vmatpush.bf16.msra.mxu1 %v2116_v24 }
 0x41c   :  { %v870_v24 = vpop.f32.mrf.mxu2 }
 0x428   :  { %1015 = vmatmul.bf16.gmra.mxu0 %v2456_v26 }
 0x438   :  { %1020 = vmatmul.bf16.gmra.mxu0 %v2462_v28 }
 0x448   :  { %1025 = vmatmul.bf16.gmra.mxu0 %v2465_v29 }
 0x458   :  { %1030 = vmatmul.bf16.gmra.mxu0 %v2468_v38 }
 0x468   :  { %1035 = vmatmul.bf16.gmra.mxu0 %v2471_v43 }
 0x475   :  { %v1001_v26 = vpop.f32.mrf.mxu0 }
 0x47d   :  { %v1003_v28 = vpop.f32.mrf.mxu0 }
 0x47e   :  { %v1041_v49 = vpack.c.bf16 %v1003_v28, %v1001_v26  ;;  %v967_v28 = vpop.f32.mrf.mxu3 }
 0x480   :  { %1121 = vmatmul.bf16.vlgmr.msra.gmra.mxu1 %v1041_v49 }
 0x485   :  { %v1006_v29 = vpop.f32.mrf.mxu0 }
 0x48d   :  { %v1008_v50 = vpop.f32.mrf.mxu0 }
 0x48e   :  { %v1042_v52 = vpack.c.bf16 %v1008_v50, %v1006_v29 }
 0x490   :  { %1126 = vmatmul.bf16.gmra.mxu1 %v1042_v52 }
 0x495   :  { %v1011_v53 = vpop.f32.mrf.mxu0 }
 0x49d   :  { %v1013_v54 = vpop.f32.mrf.mxu0 }
 0x49e   :  { %v1043_v55 = vpack.c.bf16 %v1013_v54, %v1011_v53  ;;  %v963_v53 = vadd.f32 %v962_v31, %v865_v23  ;;  %v872_v54 = vpop.f32.mrf.mxu2 }
 0x4a0   :  { %1131 = vmatmul.bf16.gmra.mxu1 %v1043_v55 }
 0x4a5   :  { %v1016_v56 = vpop.f32.mrf.mxu0 }
 0x4a6   :  { %v875_v62 = vpop.f32.mrf.mxu2 }
 0x4ad   :  { %v1018_v57 = vpop.f32.mrf.mxu0 }
 0x4ae   :  { %v1044_v38 = vpack.c.bf16 %v1018_v57, %v1016_v56  ;;  %v969_v56 = vpop.f32.mrf.mxu3  ;;  %v965_v57 = vadd.f32 %v964_v44, %v867_v41  ;;  %v877_v6 = vpop.f32.mrf.mxu2 }
 0x4af   :  { %v970_v8 = vadd.f32 %v969_v56, %v872_v54 }
 0x4b0   :  { %1136 = vmatmul.bf16.gmra.mxu1 %v1044_v38 }
 0x4b5   :  { %v1021_v58 = vpop.f32.mrf.mxu0 }
 0x4b6   :  { %v972_v1 = vpop.f32.mrf.mxu3 }
 0x4bd   :  { %v1023_v59 = vpop.f32.mrf.mxu0 }
 0x4be   :  { %v1045_v60 = vpack.c.bf16 %v1023_v59, %v1021_v58  ;;  %v974_v14 = vpop.f32.mrf.mxu3 }
 0x4bf   :  { %v975_v17 = vadd.f32 %v974_v14, %v877_v6 }
 0x4c0   :  { %1141 = vmatmul.bf16.gmra.mxu1 %v1045_v60 }
 0x4c5   :  { %v1026_v43 = vpop.f32.mrf.mxu0 }
 0x4c6   :  { %v977_v15 = vpop.f32.mrf.mxu3 }
 0x4cd   :  { %v1028_v61 = vpop.f32.mrf.mxu0 }
 0x4ce   :  { %v1046_v63 = vpack.c.bf16 %v1028_v61, %v1026_v43 }
 0x4d0   :  { %1146 = vmatmul.bf16.gmra.mxu1 %v1046_v63 }
 0x4d5   :  { %v1031_v4 = vpop.f32.mrf.mxu0 }
 0x4dd   :  { %v1033_v5 = vpop.f32.mrf.mxu0 }
 0x4de   :  { %v1047_v34 = vpack.c.bf16 %v1033_v5, %v1031_v4  ;;  %v968_v4 = vadd.f32 %v967_v28, %v870_v24 }
 0x4e0   :  { %1151 = vmatmul.bf16.gmra.mxu1 %v1047_v34 }
 0x4e5   :  { %v1036_v3 = vpop.f32.mrf.mxu0 }
 0x4ed   :  { %v1038_v12 = vpop.f32.mrf.mxu0 }
 0x4ee   :  { %v1048_v13 = vpack.c.bf16 %v1038_v12, %v1036_v3  ;;  %v880_v12 = vpop.f32.mrf.mxu2 }
 0x4f0   :  { %1156 = vmatmul.bf16.gmra.mxu1 %v1048_v13  ;;  %v973_v13 = vadd.f32 %v972_v1, %v875_v62 }
 0x4f6   :  { %v882_v23 = vpop.f32.mrf.mxu2 }
 0x4fd   :  { %v1122_v19 = vpop.f32.mrf.mxu1 }
 0x4fe   :  { %v1162_v21 = vadd.f32 %v1122_v19, %v953_v20 }
 0x500   :  { %v1182_v33 = vadd.f32 %v2546_v22, %v1162_v21 }
 0x502   :  { %v1198_v37 = vmax.f32 %v1182_v33, 0.0 }
 0x505   :  { %v1124_v32 = vpop.f32.mrf.mxu1 }
 0x506   :  { %v1163_v35 = vadd.f32 %v1124_v32, %v955_v30  ;;  %v979_v32 = vpop.f32.mrf.mxu3 }
 0x507   :  { %v980_v41 = vadd.f32 %v979_v32, %v882_v23 }
 0x508   :  { %v1183_v36 = vadd.f32 %v2546_v22, %v1163_v35 }
 0x50a   :  { %v1199_v39 = vmax.f32 %v1183_v36, 0.0  ;;  %v978_v36 = vadd.f32 %v977_v15, %v880_v12  ;;  %v2136_v12 = vld [vmem:[#allocation10 + $0x60] sm:$0xff]  ;;  %v2598_v15 = vld [vmem:[#allocation2 + $0x30] sm:$0xff] }
 0x50c   :  { %v2550_v40 = vpack.c.bf16 %v1199_v39, %v1198_v37  ;;  %v885_v39 = vpop.f32.mrf.mxu2 }
 0x50d   :  { %v1127_v42 = vpop.f32.mrf.mxu1 }
 0x50e   :  { %1464 = vmatmul.bf16.vlgmr.msrb.gmra.mxu0 %v2550_v40  ;;  %v1164_v46 = vadd.f32 %v1127_v42, %v958_v45  ;;  %v982_v42 = vpop.f32.mrf.mxu3 }
 0x510   :  { %v1184_v25 = vadd.f32 %v2546_v22, %v1164_v46 }
 0x512   :  { %v1200_v49 = vmax.f32 %v1184_v25, 0.0 }
 0x514   :  { %v887_v24 = vpop.f32.mrf.mxu2 }
 0x515   :  { %v1129_v48 = vpop.f32.mrf.mxu1 }
 0x516   :  { %v1165_v27 = vadd.f32 %v1129_v48, %v960_v47  ;;  %v984_v28 = vpop.f32.mrf.mxu3 }
 0x518   :  { %v1185_v26 = vadd.f32 %v2546_v22, %v1165_v27 }
 0x51a   :  { %v1201_v29 = vmax.f32 %v1185_v26, 0.0 }
 0x51c   :  { %v2555_v50 = vpack.c.bf16 %v1201_v29, %v1200_v49  ;;  %v983_v49 = vadd.f32 %v982_v42, %v885_v39  ;;  %v890_v56 = vpop.f32.mrf.mxu2 }
 0x51d   :  { %v1132_v52 = vpop.f32.mrf.mxu1 }
 0x51e   :  { %1469 = vmatmul.bf16.gmra.mxu0 %v2555_v50  ;;  %v1166_v55 = vadd.f32 %v1132_v52, %v963_v53  ;;  %v985_v52 = vadd.f32 %v984_v28, %v887_v24 }
 0x520   :  { %v1186_v58 = vadd.f32 %v2546_v22, %v1166_v55 }
 0x522   :  { %v1202_v43 = vmax.f32 %v1186_v58, 0.0 }
 0x524   :  { %v892_v62 = vpop.f32.mrf.mxu2 }
 0x525   :  { %v1134_v38 = vpop.f32.mrf.mxu1 }
 0x526   :  { %v1167_v59 = vadd.f32 %v1134_v38, %v965_v57  ;;  %v987_v38 = vpop.f32.mrf.mxu3 }
 0x528   :  { %v1187_v60 = vadd.f32 %v2546_v22, %v1167_v59 }
 0x52a   :  { %v1203_v61 = vmax.f32 %v1187_v60, 0.0 }
 0x52c   :  { %v2560_v63 = vpack.c.bf16 %v1203_v61, %v1202_v43  ;;  %v988_v61 = vadd.f32 %v987_v38, %v890_v56  ;;  %v2142_v56 = vld [vmem:[#allocation10 + $0x90] sm:$0xff]  ;;  %v2140_v38 = vld [vmem:[#allocation10 + $0x80] sm:$0xff] }
 0x52d   :  { %v1137_v2 = vpop.f32.mrf.mxu1 }
 0x52e   :  { %1474 = vmatmul.bf16.gmra.mxu0 %v2560_v63  ;;  %v1168_v7 = vadd.f32 %v1137_v2, %v968_v4  ;;  %v989_v2 = vpop.f32.mrf.mxu3 }
 0x52f   :  { %v990_v4 = vadd.f32 %v989_v2, %v892_v62 }
 0x530   :  { %v1188_v0 = vadd.f32 %v2546_v22, %v1168_v7 }
 0x532   :  { %v1204_v3 = vmax.f32 %v1188_v0, 0.0 }
 0x535   :  { %v1139_v5 = vpop.f32.mrf.mxu1 }
 0x536   :  { %v1169_v34 = vadd.f32 %v1139_v5, %v970_v8 }
 0x538   :  { %v1189_v51 = vadd.f32 %v2546_v22, %v1169_v34 }
 0x53a   :  { %v1205_v9 = vmax.f32 %v1189_v51, 0.0  ;;  %v2580_v51 = vld [vmem:[#allocation2] sm:$0xff] }
 0x53c   :  { %v2565_v10 = vpack.c.bf16 %v1205_v9, %v1204_v3  ;;  %v2586_v3 = vld [vmem:[#allocation2 + $0x10] sm:$0xff]  ;;  %v2589_v9 = vld [vmem:[#allocation2 + $0x18] sm:$0xff] }
 0x53d   :  { %v1142_v11 = vpop.f32.mrf.mxu1 }
 0x53e   :  { %1479 = vmatmul.bf16.gmra.mxu0 %v2565_v10  ;;  %v1170_v16 = vadd.f32 %v1142_v11, %v973_v13  ;;  %v2137_v11 = vld [vmem:[#allocation10 + $0x68] sm:$0xff]  ;;  %v2135_v13 = vld [vmem:[#allocation10 + $0x58] sm:$0xff] }
 0x540   :  { %v1190_v19 = vadd.f32 %v2546_v22, %v1170_v16  ;;  %v2134_v16 = vld [vmem:[#allocation10 + $0x50] sm:$0xff] }
 0x542   :  { %v1206_v30 = vmax.f32 %v1190_v19, 0.0  ;;  %v2601_v19 = vld [vmem:[#allocation2 + $0x38] sm:$0xff] }
 0x545   :  { %v1144_v18 = vpop.f32.mrf.mxu1 }
 0x546   :  { %v1171_v20 = vadd.f32 %v1144_v18, %v975_v17  ;;  %v2133_v17 = vld [vmem:[#allocation10 + $0x48] sm:$0xff]  ;;  %v2132_v18 = vld [vmem:[#allocation10 + $0x40] sm:$0xff] }
 0x548   :  { %v1191_v21 = vadd.f32 %v2546_v22, %v1171_v20 }
 0x54a   :  { %v1207_v31 = vmax.f32 %v1191_v21, 0.0 }
 0x54c   :  { %v1218_v33 = vpack.c.bf16 %v1207_v31, %v1206_v30 }
 0x54d   :  { %v1147_v35 = vpop.f32.mrf.mxu1 }
 0x54e   :  { %1484 = vmatmul.bf16.gmra.mxu0 %v1218_v33  ;;  %v1172_v37 = vadd.f32 %v1147_v35, %v978_v36 }
 0x550   :  { %v1192_v45 = vadd.f32 %v2546_v22, %v1172_v37 }
 0x552   :  { %v1208_v48 = vmax.f32 %v1192_v45, 0.0 }
 0x555   :  { %v1149_v44 = vpop.f32.mrf.mxu1 }
 0x556   :  { %v1173_v46 = vadd.f32 %v1149_v44, %v980_v41 }
 0x558   :  { %v1193_v47 = vadd.f32 %v2546_v22, %v1173_v46 }
 0x55a   :  { %v1209_v25 = vmax.f32 %v1193_v47, 0.0 }
 0x55c   :  { %v1219_v27 = vpack.c.bf16 %v1209_v25, %v1208_v48 }
 0x55d   :  { %v1152_v26 = vpop.f32.mrf.mxu1 }
 0x55e   :  { %1489 = vmatmul.bf16.gmra.mxu0 %v1219_v27  ;;  %v1174_v29 = vadd.f32 %v1152_v26, %v983_v49 }
 0x560   :  { %v1194_v54 = vadd.f32 %v2546_v22, %v1174_v29  ;;  %v2147_v29 = vld [vmem:[#allocation10 + $0xb8] sm:$0xff] }
 0x562   :  { %v1210_v58 = vmax.f32 %v1194_v54, 0.0  ;;  %v2144_v54 = vld [vmem:[#allocation10 + $0xa0] sm:$0xff] }
 0x565   :  { %v1154_v53 = vpop.f32.mrf.mxu1 }
 0x566   :  { %v1175_v55 = vadd.f32 %v1154_v53, %v985_v52  ;;  %v2146_v52 = vld [vmem:[#allocation10 + $0xb0] sm:$0xff]  ;;  %v2145_v53 = vld [vmem:[#allocation10 + $0xa8] sm:$0xff] }
 0x568   :  { %v1195_v57 = vadd.f32 %v2546_v22, %v1175_v55  ;;  %v2143_v55 = vld [vmem:[#allocation10 + $0x98] sm:$0xff] }
 0x56a   :  { %v1211_v59 = vmax.f32 %v1195_v57, 0.0  ;;  %v2141_v57 = vld [vmem:[#allocation10 + $0x88] sm:$0xff] }
 0x56c   :  { %v1220_v60 = vpack.c.bf16 %v1211_v59, %v1210_v58 }
 0x56d   :  { %v1157_v43 = vpop.f32.mrf.mxu1 }
 0x56e   :  { %1494 = vmatmul.bf16.gmra.mxu0 %v1220_v60  ;;  %v1176_v1 = vadd.f32 %v1157_v43, %v988_v61 }
 0x570   :  { %v1196_v8 = vadd.f32 %v2546_v22, %v1176_v1 }
 0x572   :  { %v1212_v0 = vmax.f32 %v1196_v8, 0.0 }
 0x575   :  { %v1159_v7 = vpop.f32.mrf.mxu1 }
 0x576   :  { %v1177_v6 = vadd.f32 %v1159_v7, %v990_v4 }
 0x578   :  { %v1197_v5 = vadd.f32 %v2546_v22, %v1177_v6  ;;  %v2583_v22 = vld [vmem:[#allocation2 + $0x8] sm:$0xff] }
 0x57a   :  { %v1213_v34 = vmax.f32 %v1197_v5, 0.0 }
 0x57c   :  { %v1221_v14 = vpack.c.bf16 %v1213_v34, %v1212_v0 }
 0x57e   :  { %1238 = vmatpush.bf16.msra.mxu2 %v1221_v14  ;;  %1499 = vmatmul.bf16.gmra.mxu0 %v1221_v14 }
 0x582   :  { %1239 = vmatpush.bf16.msra.mxu2 %v1220_v60 }
 0x586   :  { %1240 = vmatpush.bf16.msra.mxu2 %v1219_v27 }
 0x58a   :  { %1241 = vmatpush.bf16.msra.mxu2 %v1218_v33 }
 0x58e   :  { %1242 = vmatpush.bf16.msra.mxu2 %v2565_v10  ;;  %v2138_v10 = vld [vmem:[#allocation10 + $0x70] sm:$0xff] }
 0x592   :  { %1243 = vmatpush.bf16.msra.mxu2 %v2560_v63  ;;  %v2592_v63 = vld [vmem:[#allocation2 + $0x20] sm:$0xff] }
 0x596   :  { %1244 = vmatpush.bf16.msra.mxu2 %v2555_v50  ;;  %v2595_v50 = vld [vmem:[#allocation2 + $0x28] sm:$0xff] }
 0x59a   :  { %1245 = vmatpush.bf16.msra.mxu2 %v2550_v40  ;;  %v2139_v40 = vld [vmem:[#allocation10 + $0x78] sm:$0xff] }
 0x59b   :  { %1359 = vmatpush.bf16.msrb.mxu3 %v2139_v40 }
 0x59d   :  { %1246 = vmatmul.bf16.vlgmr.msra.gmra.mxu2 %v2580_v51 }
 0x59e   :  { %1626 = vmatpush.bf16.msrb.mxu2 %v2147_v29 }
 0x59f   :  { %1360 = vmatpush.bf16.msrb.mxu3 %v2138_v10 }
 0x5a2   :  { %1627 = vmatpush.bf16.msrb.mxu2 %v2146_v52 }
 0x5a3   :  { %1361 = vmatpush.bf16.msrb.mxu3 %v2137_v11 }
 0x5a6   :  { %1628 = vmatpush.bf16.msrb.mxu2 %v2145_v53 }
 0x5a7   :  { %1362 = vmatpush.bf16.msrb.mxu3 %v2136_v12 }
 0x5aa   :  { %1629 = vmatpush.bf16.msrb.mxu2 %v2144_v54 }
 0x5ab   :  { %1363 = vmatpush.bf16.msrb.mxu3 %v2135_v13 }
 0x5ad   :  { %1251 = vmatmul.bf16.gmra.mxu2 %v2583_v22 }
 0x5ae   :  { %1630 = vmatpush.bf16.msrb.mxu2 %v2143_v55 }
 0x5af   :  { %1364 = vmatpush.bf16.msrb.mxu3 %v2134_v16 }
 0x5b2   :  { %1631 = vmatpush.bf16.msrb.mxu2 %v2142_v56 }
 0x5b3   :  { %1365 = vmatpush.bf16.msrb.mxu3 %v2133_v17 }
 0x5b6   :  { %1632 = vmatpush.bf16.msrb.mxu2 %v2141_v57 }
 0x5b7   :  { %1366 = vmatpush.bf16.msrb.mxu3 %v2132_v18 }
 0x5ba   :  { %1633 = vmatpush.bf16.msrb.mxu2 %v2140_v38 }
 0x5bd   :  { %1256 = vmatmul.bf16.gmra.mxu2 %v2586_v3 }
 0x5cd   :  { %1261 = vmatmul.bf16.gmra.mxu2 %v2589_v9 }
 0x5dd   :  { %1266 = vmatmul.bf16.gmra.mxu2 %v2592_v63 }
 0x5ed   :  { %1271 = vmatmul.bf16.gmra.mxu2 %v2595_v50 }
 0x5fd   :  { %1276 = vmatmul.bf16.gmra.mxu2 %v2598_v15 }
 0x60d   :  { %1281 = vmatmul.bf16.gmra.mxu2 %v2601_v19 }
 0x620   :  { %v1247_v20 = vpop.f32.mrf.mxu2 }
 0x628   :  { %v1249_v21 = vpop.f32.mrf.mxu2 }
 0x629   :  { %v1287_v23 = vpack.c.bf16 %v1249_v21, %v1247_v20  ;;  %v2615_v21 = vld [vmem:[%s2646_s7] ss:$0 sm:$0xff]  ;;  %s2354_s7 = smov [#allocation11]  }
 0x62a   :  { %s1731_s13 = sshll.u32 %s2354_s7, 4  ;;  %s1732_s13 = int_to_ptr.vmem [resolvable:$true] %s1731_s13 }
 0x62b   :  { %1367 = vmatmul.bf16.vlgmr.msrb.gmra.mxu3 %v1287_v23 }
 0x630   :  { %v1252_v30 = vpop.f32.mrf.mxu2 }
 0x638   :  { %v1254_v31 = vpop.f32.mrf.mxu2 }
 0x639   :  { %v1288_v32 = vpack.c.bf16 %v1254_v31, %v1252_v30 }
 0x63b   :  { %1372 = vmatmul.bf16.gmra.mxu3 %v1288_v32 }
 0x640   :  { %v1257_v33 = vpop.f32.mrf.mxu2 }
 0x648   :  { %v1259_v35 = vpop.f32.mrf.mxu2 }
 0x649   :  { %v1289_v36 = vpack.c.bf16 %v1259_v35, %v1257_v33 }
 0x64b   :  { %1377 = vmatmul.bf16.gmra.mxu3 %v1289_v36 }
 0x650   :  { %v1262_v37 = vpop.f32.mrf.mxu2 }
 0x658   :  { %v1264_v39 = vpop.f32.mrf.mxu2 }
 0x659   :  { %v1290_v41 = vpack.c.bf16 %v1264_v39, %v1262_v37 }
 0x65b   :  { %1382 = vmatmul.bf16.gmra.mxu3 %v1290_v41 }
 0x660   :  { %v1267_v42 = vpop.f32.mrf.mxu2 }
 0x668   :  { %v1269_v44 = vpop.f32.mrf.mxu2 }
 0x669   :  { %v1291_v45 = vpack.c.bf16 %v1269_v44, %v1267_v42 }
 0x66b   :  { %1387 = vmatmul.bf16.gmra.mxu3 %v1291_v45 }
 0x670   :  { %v1272_v46 = vpop.f32.mrf.mxu2 }
 0x678   :  { %v1274_v47 = vpop.f32.mrf.mxu2 }
 0x679   :  { %v1292_v48 = vpack.c.bf16 %v1274_v47, %v1272_v46 }
 0x67b   :  { %1392 = vmatmul.bf16.gmra.mxu3 %v1292_v48 }
 0x680   :  { %v1277_v25 = vpop.f32.mrf.mxu2 }
 0x688   :  { %v1279_v27 = vpop.f32.mrf.mxu2 }
 0x689   :  { %v1293_v24 = vpack.c.bf16 %v1279_v27, %v1277_v25 }
 0x68b   :  { %1397 = vmatmul.bf16.gmra.mxu3 %v1293_v24 }
 0x690   :  { %v1282_v26 = vpop.f32.mrf.mxu2 }
 0x698   :  { %v1284_v28 = vpop.f32.mrf.mxu2 }
 0x699   :  { %v1294_v49 = vpack.c.bf16 %v1284_v28, %v1282_v26 }
 0x69b   :  { %1402 = vmatmul.bf16.gmra.mxu3 %v1294_v49  ;;  %1505 = vmatpush.bf16.msrb.mxu1 %v1294_v49 }
 0x69f   :  { %1506 = vmatpush.bf16.msrb.mxu1 %v1293_v24 }
 0x6a3   :  { %1507 = vmatpush.bf16.msrb.mxu1 %v1292_v48 }
 0x6a7   :  { %1508 = vmatpush.bf16.msrb.mxu1 %v1291_v45 }
 0x6ab   :  { %1509 = vmatpush.bf16.msrb.mxu1 %v1290_v41 }
 0x6ae   :  { %v1368_v40 = vpop.f32.mrf.mxu3 }
 0x6af   :  { %1510 = vmatpush.bf16.msrb.mxu1 %v1289_v36 }
 0x6b3   :  { %1511 = vmatpush.bf16.msrb.mxu1 %v1288_v32 }
 0x6b6   :  { %v1370_v11 = vpop.f32.mrf.mxu3 }
 0x6b7   :  { %1512 = vmatpush.bf16.msrb.mxu1 %v1287_v23 }
 0x6ba   :  { %1513 = vmatmul.bf16.vlgmr.msrb.gmra.mxu1 %v2580_v51 }
 0x6be   :  { %v1373_v16 = vpop.f32.mrf.mxu3 }
 0x6c6   :  { %v1375_v18 = vpop.f32.mrf.mxu3 }
 0x6ca   :  { %1518 = vmatmul.bf16.gmra.mxu1 %v2583_v22 }
 0x6ce   :  { %v1378_v32 = vpop.f32.mrf.mxu3 }
 0x6d6   :  { %v1380_v42 = vpop.f32.mrf.mxu3 }
 0x6da   :  { %1523 = vmatmul.bf16.gmra.mxu1 %v2586_v3 }
 0x6de   :  { %v1383_v24 = vpop.f32.mrf.mxu3 }
 0x6e6   :  { %v1385_v54 = vpop.f32.mrf.mxu3 }
 0x6ea   :  { %1528 = vmatmul.bf16.gmra.mxu1 %v2589_v9 }
 0x6fa   :  { %1533 = vmatmul.bf16.gmra.mxu1 %v2592_v63 }
 0x70a   :  { %1538 = vmatmul.bf16.gmra.mxu1 %v2595_v50  ;;  %v1465_v50 = vpop.f32.mrf.mxu0 }
 0x70b   :  { %v1466_v20 = vadd.f32 %v1465_v50, %v1368_v40 }
 0x712   :  { %v1467_v12 = vpop.f32.mrf.mxu0 }
 0x713   :  { %v1468_v33 = vadd.f32 %v1467_v12, %v1370_v11 }
 0x71a   :  { %1543 = vmatmul.bf16.gmra.mxu1 %v2598_v15  ;;  %v1470_v17 = vpop.f32.mrf.mxu0 }
 0x71b   :  { %v1471_v41 = vadd.f32 %v1470_v17, %v1373_v16 }
 0x72a   :  { %1548 = vmatmul.bf16.gmra.mxu1 %v2601_v19  ;;  %v1472_v19 = vpop.f32.mrf.mxu0 }
 0x72b   :  { %v1473_v48 = vadd.f32 %v1472_v19, %v1375_v18 }
 0x732   :  { %v1475_v35 = vpop.f32.mrf.mxu0 }
 0x733   :  { %v1476_v49 = vadd.f32 %v1475_v35, %v1378_v32 }
 0x737   :  { %v1514_v58 = vpop.f32.mrf.mxu1 }
 0x73a   :  { %v1477_v46 = vpop.f32.mrf.mxu0 }
 0x73b   :  { %v1478_v56 = vadd.f32 %v1477_v46, %v1380_v42 }
 0x73f   :  { %v1516_v59 = vpop.f32.mrf.mxu1 }
 0x740   :  { %v1554_v60 = vpack.c.bf16 %v1516_v59, %v1514_v58  ;;  %v1388_v59 = vpop.f32.mrf.mxu3 }
 0x742   :  { %1634 = vmatmul.bf16.vlgmr.msrb.gmra.mxu2 %v1554_v60  ;;  %v1480_v28 = vpop.f32.mrf.mxu0 }
 0x743   :  { %v1481_v60 = vadd.f32 %v1480_v28, %v1383_v24 }
 0x747   :  { %v1519_v43 = vpop.f32.mrf.mxu1 }
 0x74a   :  { %v1482_v55 = vpop.f32.mrf.mxu0 }
 0x74f   :  { %v1521_v61 = vpop.f32.mrf.mxu1 }
 0x750   :  { %v1555_v62 = vpack.c.bf16 %v1521_v61, %v1519_v43 }
 0x752   :  { %1639 = vmatmul.bf16.gmra.mxu2 %v1555_v62  ;;  %v1485_v43 = vpop.f32.mrf.mxu0 }
 0x757   :  { %v1524_v1 = vpop.f32.mrf.mxu1 }
 0x75f   :  { %v1526_v2 = vpop.f32.mrf.mxu1 }
 0x760   :  { %v1556_v4 = vpack.c.bf16 %v1526_v2, %v1524_v1  ;;  %v1483_v2 = vadd.f32 %v1482_v55, %v1385_v54 }
 0x762   :  { %1644 = vmatmul.bf16.gmra.mxu2 %v1556_v4  ;;  %v1390_v4 = vpop.f32.mrf.mxu3 }
 0x767   :  { %v1529_v7 = vpop.f32.mrf.mxu1 }
 0x76f   :  { %v1531_v8 = vpop.f32.mrf.mxu1 }
 0x770   :  { %v1557_v6 = vpack.c.bf16 %v1531_v8, %v1529_v7 }
 0x772   :  { %1649 = vmatmul.bf16.gmra.mxu2 %v1557_v6  ;;  %v1487_v6 = vpop.f32.mrf.mxu0 }
 0x777   :  { %v1534_v5 = vpop.f32.mrf.mxu1 }
 0x77f   :  { %v1536_v0 = vpop.f32.mrf.mxu1 }
 0x780   :  { %v1558_v34 = vpack.c.bf16 %v1536_v0, %v1534_v5  ;;  %v1486_v0 = vadd.f32 %v1485_v43, %v1388_v59 }
 0x782   :  { %1654 = vmatmul.bf16.gmra.mxu2 %v1558_v34 }
 0x787   :  { %v1539_v14 = vpop.f32.mrf.mxu1 }
 0x78f   :  { %v1541_v51 = vpop.f32.mrf.mxu1 }
 0x790   :  { %v1559_v22 = vpack.c.bf16 %v1541_v51, %v1539_v14  ;;  %v1393_v51 = vpop.f32.mrf.mxu3 }
 0x792   :  { %1659 = vmatmul.bf16.gmra.mxu2 %v1559_v22 }
 0x797   :  { %v1544_v3 = vpop.f32.mrf.mxu1 }
 0x79f   :  { %v1546_v9 = vpop.f32.mrf.mxu1 }
 0x7a0   :  { %v1560_v63 = vpack.c.bf16 %v1546_v9, %v1544_v3  ;;  %v1490_v3 = vpop.f32.mrf.mxu0  ;;  %v1488_v9 = vadd.f32 %v1487_v6, %v1390_v4 }
 0x7a1   :  { %v1491_v12 = vadd.f32 %v1490_v3, %v1393_v51 }
 0x7a2   :  { %1664 = vmatmul.bf16.gmra.mxu2 %v1560_v63 }
 0x7a7   :  { %v1549_v10 = vpop.f32.mrf.mxu1 }
 0x7a8   :  { %v1492_v11 = vpop.f32.mrf.mxu0 }
 0x7af   :  { %v1551_v13 = vpop.f32.mrf.mxu1 }
 0x7b0   :  { %v1561_v15 = vpack.c.bf16 %v1551_v13, %v1549_v10  ;;  %v1395_v10 = vpop.f32.mrf.mxu3  ;;  %v1495_v19 = vpop.f32.mrf.mxu0 }
 0x7b1   :  { %v1493_v18 = vadd.f32 %v1492_v11, %v1395_v10 }
 0x7b2   :  { %1669 = vmatmul.bf16.gmra.mxu2 %v1561_v15 }
 0x7b8   :  { %v1398_v17 = vpop.f32.mrf.mxu3 }
 0x7c0   :  { %v1400_v32 = vpop.f32.mrf.mxu3 }
 0x7c5   :  { %v1635_v23 = vpop.f32.mrf.mxu2 }
 0x7c6   :  { %v1675_v30 = vadd.f32 %v1635_v23, %v1466_v20 }
 0x7c8   :  { %v1695_v31 = vadd.f32 %v2615_v21, %v1675_v30 }
 0x7ca   :  { %1711 = vst [vmem:[#allocation11] sm:$0xff] %v1695_v31  ;;  %v1496_v31 = vadd.f32 %v1495_v19, %v1398_v17 }
 0x7cd   :  { %v1637_v36 = vpop.f32.mrf.mxu2 }
 0x7ce   :  { %v1676_v37 = vadd.f32 %v1637_v36, %v1468_v33  ;;  %v1497_v36 = vpop.f32.mrf.mxu0 }
 0x7d0   :  { %v1696_v39 = vadd.f32 %v2615_v21, %v1676_v37 }
 0x7d2   :  { %1712 = vst [vmem:[#allocation11 + $0x8] sm:$0xff] %v1696_v39  ;;  %v1498_v39 = vadd.f32 %v1497_v36, %v1400_v32 }
 0x7d5   :  { %v1640_v44 = vpop.f32.mrf.mxu2 }
 0x7d6   :  { %v1677_v45 = vadd.f32 %v1640_v44, %v1471_v41  ;;  %v1403_v44 = vpop.f32.mrf.mxu3  ;;  %v1500_v46 = vpop.f32.mrf.mxu0 }
 0x7d8   :  { %v1697_v47 = vadd.f32 %v2615_v21, %v1677_v45 }
 0x7da   :  { %1713 = vst [vmem:[#allocation11 + $0x10] sm:$0xff] %v1697_v47  ;;  %v1501_v47 = vadd.f32 %v1500_v46, %v1403_v44 }
 0x7dd   :  { %v1642_v25 = vpop.f32.mrf.mxu2 }
 0x7de   :  { %v1678_v27 = vadd.f32 %v1642_v25, %v1473_v48  ;;  %v1405_v24 = vpop.f32.mrf.mxu3 }
 0x7e0   :  { %v1698_v26 = vadd.f32 %v2615_v21, %v1678_v27 }
 0x7e2   :  { %1714 = vst [vmem:[#allocation11 + $0x18] sm:$0xff] %v1698_v26  ;;  %v1502_v26 = vpop.f32.mrf.mxu0 }
 0x7e3   :  { %v1503_v28 = vadd.f32 %v1502_v26, %v1405_v24 }
 0x7e5   :  { %v1645_v29 = vpop.f32.mrf.mxu2 }
 0x7e6   :  { %v1679_v52 = vadd.f32 %v1645_v29, %v1476_v49 }
 0x7e8   :  { %v1699_v53 = vadd.f32 %v2615_v21, %v1679_v52 }
 0x7ea   :  { %1715 = vst [vmem:[#allocation11 + $0x20] sm:$0xff] %v1699_v53 }
 0x7ed   :  { %v1647_v57 = vpop.f32.mrf.mxu2 }
 0x7ee   :  { %v1680_v38 = vadd.f32 %v1647_v57, %v1478_v56 }
 0x7f0   :  { %v1700_v58 = vadd.f32 %v2615_v21, %v1680_v38 }
 0x7f2   :  { %1716 = vst [vmem:[#allocation11 + $0x28] sm:$0xff] %v1700_v58 }
 0x7f5   :  { %v1650_v61 = vpop.f32.mrf.mxu2 }
 0x7f6   :  { %v1681_v62 = vadd.f32 %v1650_v61, %v1481_v60 }
 0x7f8   :  { %v1701_v1 = vadd.f32 %v2615_v21, %v1681_v62 }
 0x7fa   :  { %1717 = vst [vmem:[#allocation11 + $0x30] sm:$0xff] %v1701_v1 }
 0x7fd   :  { %v1652_v7 = vpop.f32.mrf.mxu2 }
 0x7fe   :  { %v1682_v8 = vadd.f32 %v1652_v7, %v1483_v2 }
 0x800   :  { %v1702_v5 = vadd.f32 %v2615_v21, %v1682_v8 }
 0x802   :  { %1718 = vst [vmem:[#allocation11 + $0x38] sm:$0xff] %v1702_v5 }
 0x805   :  { %v1655_v34 = vpop.f32.mrf.mxu2 }
 0x806   :  { %v1683_v14 = vadd.f32 %v1655_v34, %v1486_v0 }
 0x808   :  { %v1703_v22 = vadd.f32 %v2615_v21, %v1683_v14 }
 0x80a   :  { %1719 = vst [vmem:[#allocation11 + $0x40] sm:$0xff] %v1703_v22 }
 0x80d   :  { %v1657_v63 = vpop.f32.mrf.mxu2 }
 0x80e   :  { %v1684_v40 = vadd.f32 %v1657_v63, %v1488_v9 }
 0x810   :  { %v1704_v50 = vadd.f32 %v2615_v21, %v1684_v40 }
 0x812   :  { %1720 = vst [vmem:[#allocation11 + $0x48] sm:$0xff] %v1704_v50 }
 0x815   :  { %v1660_v13 = vpop.f32.mrf.mxu2 }
 0x816   :  { %v1685_v15 = vadd.f32 %v1660_v13, %v1491_v12 }
 0x818   :  { %v1705_v16 = vadd.f32 %v2615_v21, %v1685_v15 }
 0x81a   :  { %1721 = vst [vmem:[#allocation11 + $0x50] sm:$0xff] %v1705_v16 }
 0x81d   :  { %v1662_v20 = vpop.f32.mrf.mxu2 }
 0x81e   :  { %v1686_v23 = vadd.f32 %v1662_v20, %v1493_v18 }
 0x820   :  { %v1706_v30 = vadd.f32 %v2615_v21, %v1686_v23 }
 0x822   :  { %1722 = vst [vmem:[#allocation11 + $0x58] sm:$0xff] %v1706_v30 }
 0x825   :  { %v1665_v33 = vpop.f32.mrf.mxu2 }
 0x826   :  { %v1687_v35 = vadd.f32 %v1665_v33, %v1496_v31 }
 0x828   :  { %v1707_v37 = vadd.f32 %v2615_v21, %v1687_v35 }
 0x82a   :  { %1723 = vst [vmem:[#allocation11 + $0x60] sm:$0xff] %v1707_v37 }
 0x82d   :  { %v1667_v41 = vpop.f32.mrf.mxu2 }
 0x82e   :  { %v1688_v42 = vadd.f32 %v1667_v41, %v1498_v39 }
 0x830   :  { %v1708_v45 = vadd.f32 %v2615_v21, %v1688_v42 }
 0x832   :  { %1724 = vst [vmem:[#allocation11 + $0x68] sm:$0xff] %v1708_v45 }
 0x835   :  { %v1670_v48 = vpop.f32.mrf.mxu2 }
 0x836   :  { %v1689_v25 = vadd.f32 %v1670_v48, %v1501_v47 }
 0x838   :  { %v1709_v27 = vadd.f32 %v2615_v21, %v1689_v25 }
 0x83a   :  { %1725 = vst [vmem:[#allocation11 + $0x70] sm:$0xff] %v1709_v27 }
 0x83d   :  { %v1672_v49 = vpop.f32.mrf.mxu2 }
 0x83e   :  { %v1690_v29 = vadd.f32 %v1672_v49, %v1503_v28 }
 0x840   :  { %v1710_v52 = vadd.f32 %v2615_v21, %v1690_v29 }
 0x842   :  { %1726 = vst [vmem:[#allocation11 + $0x78] sm:$0xff] %v1710_v52 }
 0x843   :  { %1739 = dma.vmem_to_hbm [thread:$0]  %s1732_s13, 2048, %s1734_s16, [#allocation4], %s2346_s10, %s2346_s10, %s2347_s11  }
 0x844   :  { %2343 = dma.done.wait [#allocation4], 2048  }
 0x845   :  { %2344 = vsyncadd [#allocation4], 4294965248 }
 0x846   :  { %1744 = vsyncpa [#allocation3], 1 }
 0x847   :  { %1745 = vsyncpa [#allocation6], 1 }
 0x848   :  { %1746 = vsyncpa [#allocation9], 1 }
 0x849   :  { %1747 = vsyncpa [#allocation4], 1 }

</bundles_post_ra>
